<compile_context>
chip_gen: v5e
topology: v5e:2x2
jax: 0.10.0
libtpu: 0.0.40
codegen_flags: <defaults>
</compile_context>

<pallas_src>
import functools

import jax
import jax.numpy as jnp
import numpy as np
from jax.experimental import pallas as pl
from jax.experimental.pallas import tpu as pltpu

# MXU operand dtype.  Kept f32 so the f32 reference check passes at tight
# tolerance; set to jnp.bfloat16 on v6e/v7x for MXU-native operands (~2x).
# The cosine rsqrt-normalization below always stays in f32 so the 1e-24
# epsilon is never flushed.
_MXU_DTYPE = jnp.float32


# ---------------------------------------------------------------------------
# Fused kernel: similarity maps + fused conv chains + attention + MLP + softmax
# (one grid step == one batch item; everything lives in VMEM)
# ---------------------------------------------------------------------------
def _qacnn_fused_kernel(p_ref, q_ref, c_ref, uf_ref, *refs,
                        n_layers, pads, ksize, opt_num, fnum):
    out_ref = refs[-1]
    ws = refs[:-1]
    conv_wb = ws[:2 * n_layers]            # fused (block-diag) conv: (w_flat, b) per layer
    (wpq_r, bpq_r, wpc_r, bpc_r,
     w1_r, b1_r, w2_r, b2_r) = ws[2 * n_layers:]

    def normalize(x):  # cosine normalization, f32 (epsilon must stay f32)
        return x * jax.lax.rsqrt(
            jnp.maximum(jnp.sum(x * x, axis=-1, keepdims=True), 1e-24))

    def mm(a, b):      # a @ b on the MXU, f32 accumulation
        return jax.lax.dot_general(
            a.astype(_MXU_DTYPE), b.astype(_MXU_DTYPE),
            dimension_numbers=(((1,), (0,)), ((), ())),
            preferred_element_type=jnp.float32)

    def mm_t(a, b):    # a @ b.T on the MXU, f32 accumulation
        return jax.lax.dot_general(
            a.astype(_MXU_DTYPE), b.astype(_MXU_DTYPE),
            dimension_numbers=(((1,), (1,)), ((), ())),
            preferred_element_type=jnp.float32)

    def conv_layer(x, w_flat, bias, pad):
        # x: (L, C). One im2col matmul (L_out, K*C) @ (K*C, Cout).
        if pad:
            z = jnp.zeros((pad, x.shape[1]), x.dtype)
            x = jnp.concatenate([z, x, z], axis=0)
        l_out = x.shape[0] - ksize + 1
        xw = jnp.concatenate([x[k:k + l_out, :] for k in range(ksize)], axis=-1)
        return mm(xw, w_flat) + bias

    def conv_chain(x, wb):
        out = x
        for i in range(n_layers - 1):
            prev = out
            out = jax.nn.relu(
                conv_layer(out, wb[2 * i][...], wb[2 * i + 1][...], pads[i]))
            # dropout == identity at inference
            if i > 0:
                out = out + prev
        return conv_layer(out, wb[-2][...], wb[-1][...], pads[-1])

    pn = normalize(p_ref[0])   # (P, D)   normalized once, shared by pq + all O maps
    qn = normalize(q_ref[0])   # (Q, D)
    cn = normalize(c_ref[0])   # (O*Cl, D)

    pq_map = mm_t(pn, qn)      # (P, Q)
    pc_map = mm_t(pn, cn)      # (P, O*Cl)  all options in one matmul

    # All three conv chains fused: channels = [att:Q | pq:Q | O options * Cl],
    # weights are block-diagonal, so every layer is ONE lane-dense matmul.
    x_all = jnp.concatenate([pq_map, pq_map, pc_map], axis=-1)   # (P, 2Q + O*Cl)
    conv_out = conv_chain(x_all, conv_wb)                        # (L1, (2+O)*F)
    ca = conv_out[:, :fnum]                                      # (L1, F)
    cq = conv_out[:, fnum:2 * fnum]                              # (L1, F)
    cc = conv_out[:, 2 * fnum:]                                  # (L1, O*F)

    first_att = jax.nn.sigmoid(jnp.max(ca, axis=-1, keepdims=True))           # (L1, 1)
    rep_pq = jax.nn.relu(jnp.max(cq, axis=0, keepdims=True))                  # (1, F)
    rep_pc_row = jnp.max(jax.nn.relu(cc) * first_att, axis=0, keepdims=True)  # (1, O*F)
    # unpack the lane-stacked per-option reps into (O, F) for the shared linears
    rep_pc = jnp.concatenate(
        [rep_pc_row[:, o * fnum:(o + 1) * fnum] for o in range(opt_num)], axis=0)

    second_att = jax.nn.sigmoid(mm(rep_pq, wpq_r[...]) + bpq_r[...])   # (1, F)
    second_pc = jax.nn.relu(mm(rep_pc, wpc_r[...]) + bpc_r[...])       # (O, F)
    final = second_att * second_pc                                     # (O, F)
    # output dropout == identity at inference
    h = jnp.tanh(mm(final, w1_r[...]) + b1_r[...])                     # (O, dnn)

    # torch.cat([h, useful_feat], -1) @ w2  ==  one matmul with the
    # pre-concatenated (1, dnn+U) weight row; logits laid out as a (1, O) row.
    hu = jnp.concatenate([h, uf_ref[0]], axis=-1)                      # (O, dnn+U)
    logits = mm_t(w2_r[...], hu) + b2_r[...]                           # (1, O)
    m = jnp.max(logits, axis=-1, keepdims=True)
    e = jnp.exp(logits - m)
    out_ref[0] = e / jnp.sum(e, axis=-1, keepdims=True)                # (1, O)


# ---------------------------------------------------------------------------
# Wrapper: weight preprocessing (pure JAX, one-off) + one pallas_call
# ---------------------------------------------------------------------------
def qacnn_1d_forward(params, p, q, c, useful_feat):
    b_sz, o_num, c_len, d = c.shape
    p_len, q_len = p.shape[1], q.shape[1]
    u_dim = useful_feat.shape[-1]
    k_size = params["conv_att"][0][0].shape[0]
    f_num = params["conv_att"][0][0].shape[2]
    n_layers = len(params["conv_att"])
    pads = tuple(layer[2] for layer in params["conv_att"])

    # ---- build one block-diagonal weight per conv layer over the groups
    #      [att, pq, option_0, ..., option_{O-1}] so the whole layer is one matmul
    conv_weights = []
    for l in range(n_layers):
        w_att, b_att, _ = params["conv_att"][l]
        w_pq, b_pq, _ = params["conv_pq"][l]
        w_pc, b_pc, _ = params["conv_pc"][l]
        groups = [(w_att, b_att), (w_pq, b_pq)] + [(w_pc, b_pc)] * o_num
        cins = [int(w.shape[1]) for w, _b in groups]
        total_cin = sum(cins)
        g_num = len(groups)
        wl = jnp.zeros((k_size, total_cin, g_num * f_num), jnp.float32)
        off = 0
        for g, (w, _b) in enumerate(groups):
            wl = wl.at[:, off:off + cins[g], g * f_num:(g + 1) * f_num].set(w)
            off += cins[g]
        bl = jnp.concatenate([b for _w, b in groups], axis=-1)        # (1, G*F)
        conv_weights += [wl.reshape(k_size * total_cin, g_num * f_num), bl]

    wpq, bpq, wpc, bpc, w1, b1, w2d, w2u, b2 = params["linears"]
    w2cat = jnp.concatenate([w2d, w2u], axis=0).T                     # (1, dnn+U)
    weights = conv_weights + [wpq, bpq, wpc, bpc, w1, b1, w2cat, b2]

    c_flat = c.reshape(b_sz, o_num * c_len, d)   # options stacked on length axis

    def wspec(shape):
        nd = len(shape)
        return pl.BlockSpec(shape, lambda i, _nd=nd: (0,) * _nd)

    in_specs = [
        pl.BlockSpec((1, p_len, d), lambda i: (i, 0, 0)),
        pl.BlockSpec((1, q_len, d), lambda i: (i, 0, 0)),
        pl.BlockSpec((1, o_num * c_len, d), lambda i: (i, 0, 0)),
        pl.BlockSpec((1, o_num, u_dim), lambda i: (i, 0, 0)),
    ] + [wspec(tuple(w.shape)) for w in weights]

    kernel = functools.partial(
        _qacnn_fused_kernel, n_layers=n_layers, pads=pads, ksize=k_size,
        opt_num=o_num, fnum=f_num)

    out = pl.pallas_call(
        kernel,
        grid=(b_sz,),
        in_specs=in_specs,
        out_specs=pl.BlockSpec((1, 1, o_num), lambda i: (i, 0, 0)),
        out_shape=jax.ShapeDtypeStruct((b_sz, 1, o_num), jnp.float32),
        compiler_params=pltpu.CompilerParams(
            dimension_semantics=("parallel",)),
    )(p, q, c_flat, useful_feat, *weights)
    return out[:, 0, :]


# ---------------------------------------------------------------------------
# Deterministic parameter init (same shapes as the PyTorch module __init__)
# ---------------------------------------------------------------------------
def init_params(key, question_length, option_length, filter_num, filter_size,
                cnn_layers, dnn_size, useful_feat_dim):
    keys = iter(jax.random.split(key, 64))

    def dense(shape, fan_in):
        lim = 1.0 / np.sqrt(fan_in)
        return jax.random.uniform(next(keys), shape, jnp.float32, -lim, lim)

    def conv_stack(in_ch):
        layers = []
        cin = in_ch
        for idx in range(cnn_layers):
            pad = 0 if idx == 0 else (filter_size - 1) // 2
            w = dense((filter_size, cin, filter_num), cin * filter_size)
            b = dense((1, filter_num), cin * filter_size)
            layers.append((w, b, pad))
            cin = filter_num
        return layers

    params = {
        "conv_att": conv_stack(question_length),
        "conv_pq": conv_stack(question_length),
        "conv_pc": conv_stack(option_length),
    }
    wpq = dense((filter_num, filter_num), filter_num)
    bpq = dense((1, filter_num), filter_num)
    wpc = dense((filter_num, filter_num), filter_num)
    bpc = dense((1, filter_num), filter_num)
    w1 = dense((filter_num, dnn_size), filter_num)
    b1 = dense((1, dnn_size), filter_num)
    w2 = dense((dnn_size + useful_feat_dim, 1), dnn_size + useful_feat_dim)
    b2 = dense((1, 1), dnn_size + useful_feat_dim)
    params["linears"] = (wpq, bpq, wpc, bpc, w1, b1, w2[:dnn_size], w2[dnn_size:], b2)
    return params


# ---------------------------------------------------------------------------
# Pure-JAX reference (per-chain, un-fused weights) for a correctness check
# ---------------------------------------------------------------------------
def qacnn_1d_reference(params, p, q, c, useful_feat):
    b_sz, o, cl, d = c.shape

    def norm(x):
        return x * jax.lax.rsqrt(jnp.maximum(jnp.sum(x * x, -1, keepdims=True), 1e-24))

    def sim(a, b):
        return jnp.einsum('nld,nmd->nlm', norm(a), norm(b))

    def conv(x, w, b, pad):
        if pad:
            x = jnp.pad(x, ((0, 0), (pad, pad), (0, 0)))
        k_size = w.shape[0]
        l_out = x.shape[1] - k_size + 1
        acc = sum(jnp.einsum('nli,io->nlo', x[:, k:k + l_out, :], w[k]) for k in range(k_size))
        return acc + b[None]

    def chain(x, layers):
        out = x
        for i in range(len(layers) - 1):
            prev = out
            w, bb, pad = layers[i]
            out = jax.nn.relu(conv(out, w, bb, pad))
            if i > 0:
                out = out + prev
        w, bb, pad = layers[-1]
        return conv(out, w, bb, pad)

    pq = sim(p, q)
    p_exp = jnp.broadcast_to(p[:, None], (b_sz, o) + p.shape[1:]).reshape(b_sz * o, p.shape[1], d)
    pc = sim(p_exp, c.reshape(b_sz * o, cl, d))
    ca = chain(pq, params["conv_att"])
    cq = chain(pq, params["conv_pq"])
    cc = chain(pc, params["conv_pc"])
    cc = cc.reshape(b_sz, o, cc.shape[1], cc.shape[2])
    att = jax.nn.sigmoid(jnp.max(ca, -1))                          # (B, L1)
    rep_pq = jax.nn.relu(jnp.max(cq, 1))                           # (B, F)
    rep_pc = jnp.max(jax.nn.relu(cc) * att[:, None, :, None], 2)   # (B, O, F)
    wpq, bpq, wpc, bpc, w1, b1, w2d, w2u, b2 = params["linears"]
    s_att = jax.nn.sigmoid(rep_pq @ wpq + bpq)
    s_pc = jax.nn.relu(rep_pc @ wpc + bpc)
    final = s_att[:, None, :] * s_pc
    h = jnp.tanh(final @ w1 + b1)
    logits = (h @ w2d)[..., 0] + (useful_feat @ w2u)[..., 0] + b2[0, 0]
    return jax.nn.softmax(logits, axis=-1)


if __name__ == "__main__":
    B, O = 2, 4
    question_length, option_length = 8, 10
    passage_length = 16
    word_dim = 32
    filter_num, filter_size, cnn_layers = 16, 3, 2
    dnn_size, useful_feat_dim = 32, 27

    key = jax.random.PRNGKey(0)
    kp, kq, kc, ku, kw = jax.random.split(key, 5)
    p = jax.random.normal(kp, (B, passage_length, word_dim), jnp.float32)
    q = jax.random.normal(kq, (B, question_length, word_dim), jnp.float32)
    c = jax.random.normal(kc, (B, O, option_length, word_dim), jnp.float32)
    useful_feat = jax.random.normal(ku, (B, O, useful_feat_dim), jnp.float32)

    params = init_params(kw, question_length, option_length, filter_num,
                         filter_size, cnn_layers, dnn_size, useful_feat_dim)

    out = jax.block_until_ready(qacnn_1d_forward(params, p, q, c, useful_feat))
    ref = jax.block_until_ready(qacnn_1d_reference(params, p, q, c, useful_feat))

    assert out.shape == (B, O)
    np.testing.assert_allclose(np.asarray(out), np.asarray(ref), rtol=1e-4, atol=1e-5)
    np.testing.assert_allclose(np.asarray(out).sum(-1), 1.0, rtol=1e-5, atol=1e-5)
    print("KERNEL_OK")
</pallas_src>

<mosaic_0001>
module attributes {stable_mosaic.version = 11 : i64} {
  func.func @_qacnn_fused_kernel(%arg0: i32, %arg1: memref<1x16x32xf32, #tpu.memory_space<vmem>>, %arg2: memref<1x8x32xf32, #tpu.memory_space<vmem>>, %arg3: memref<1x40x32xf32, #tpu.memory_space<vmem>>, %arg4: memref<1x4x27xf32, #tpu.memory_space<vmem>>, %arg5: memref<168x96xf32, #tpu.memory_space<vmem>>, %arg6: memref<1x96xf32, #tpu.memory_space<vmem>>, %arg7: memref<288x96xf32, #tpu.memory_space<vmem>>, %arg8: memref<1x96xf32, #tpu.memory_space<vmem>>, %arg9: memref<16x16xf32, #tpu.memory_space<vmem>>, %arg10: memref<1x16xf32, #tpu.memory_space<vmem>>, %arg11: memref<16x16xf32, #tpu.memory_space<vmem>>, %arg12: memref<1x16xf32, #tpu.memory_space<vmem>>, %arg13: memref<16x32xf32, #tpu.memory_space<vmem>>, %arg14: memref<1x32xf32, #tpu.memory_space<vmem>>, %arg15: memref<1x59xf32, #tpu.memory_space<vmem>>, %arg16: memref<1x1xf32, #tpu.memory_space<vmem>>, %arg17: memref<1x1x4xf32, #tpu.memory_space<vmem>>) attributes {dimension_semantics = [#tpu.dimension_semantics<parallel>], iteration_bounds = array<i64: 2>, scalar_prefetch = 0 : i64, scratch_operands = 0 : i64, tpu.core_type = #tpu.core_type<tc>, window_params = [{transform_indices = @transform_0, window_bounds = array<i64: 1, 16, 32>}, {transform_indices = @transform_1, window_bounds = array<i64: 1, 8, 32>}, {transform_indices = @transform_2, window_bounds = array<i64: 1, 40, 32>}, {transform_indices = @transform_3, window_bounds = array<i64: 1, 4, 27>}, {pipeline_mode = #tpu.pipeline_mode<synchronous>, transform_indices = @transform_4, window_bounds = array<i64: 168, 96>}, {pipeline_mode = #tpu.pipeline_mode<synchronous>, transform_indices = @transform_5, window_bounds = array<i64: 1, 96>}, {pipeline_mode = #tpu.pipeline_mode<synchronous>, transform_indices = @transform_6, window_bounds = array<i64: 288, 96>}, {pipeline_mode = #tpu.pipeline_mode<synchronous>, transform_indices = @transform_7, window_bounds = array<i64: 1, 96>}, {pipeline_mode = #tpu.pipeline_mode<synchronous>, transform_indices = @transform_8, window_bounds = array<i64: 16, 16>}, {pipeline_mode = #tpu.pipeline_mode<synchronous>, transform_indices = @transform_9, window_bounds = array<i64: 1, 16>}, {pipeline_mode = #tpu.pipeline_mode<synchronous>, transform_indices = @transform_10, window_bounds = array<i64: 16, 16>}, {pipeline_mode = #tpu.pipeline_mode<synchronous>, transform_indices = @transform_11, window_bounds = array<i64: 1, 16>}, {pipeline_mode = #tpu.pipeline_mode<synchronous>, transform_indices = @transform_12, window_bounds = array<i64: 16, 32>}, {pipeline_mode = #tpu.pipeline_mode<synchronous>, transform_indices = @transform_13, window_bounds = array<i64: 1, 32>}, {pipeline_mode = #tpu.pipeline_mode<synchronous>, transform_indices = @transform_14, window_bounds = array<i64: 1, 59>}, {pipeline_mode = #tpu.pipeline_mode<synchronous>, transform_indices = @transform_15, window_bounds = array<i64: 1, 1>}, {transform_indices = @transform_16, window_bounds = array<i64: 1, 1, 4>}]} {
    %c0 = arith.constant 0 : index
    %c0_0 = arith.constant 0 : index
    %c0_1 = arith.constant 0 : index
    %0 = vector.load %arg1[%c0, %c0_0, %c0_1] : memref<1x16x32xf32, #tpu.memory_space<vmem>>, vector<1x16x32xf32>
    %1 = vector.shape_cast %0 : vector<1x16x32xf32> to vector<16x32xf32>
    %2 = arith.mulf %1, %1 : vector<16x32xf32>
    %cst = arith.constant dense<0.000000e+00> : vector<16xf32>
    %3 = vector.multi_reduction <add>, %2, %cst [1] : vector<16x32xf32> to vector<16xf32>
    %4 = vector.shape_cast %3 : vector<16xf32> to vector<16x1xf32>
    %cst_2 = arith.constant 1.000000e-24 : f32
    %5 = vector.broadcast %cst_2 : f32 to vector<16x1xf32>
    %6 = arith.maximumf %4, %5 : vector<16x1xf32>
    %7 = math.rsqrt %6 : vector<16x1xf32>
    %8 = vector.broadcast %7 : vector<16x1xf32> to vector<16x32xf32>
    %9 = arith.mulf %1, %8 : vector<16x32xf32>
    %c0_3 = arith.constant 0 : index
    %c0_4 = arith.constant 0 : index
    %c0_5 = arith.constant 0 : index
    %10 = vector.load %arg2[%c0_3, %c0_4, %c0_5] : memref<1x8x32xf32, #tpu.memory_space<vmem>>, vector<1x8x32xf32>
    %11 = vector.shape_cast %10 : vector<1x8x32xf32> to vector<8x32xf32>
    %12 = arith.mulf %11, %11 : vector<8x32xf32>
    %cst_6 = arith.constant dense<0.000000e+00> : vector<8xf32>
    %13 = vector.multi_reduction <add>, %12, %cst_6 [1] : vector<8x32xf32> to vector<8xf32>
    %14 = vector.shape_cast %13 : vector<8xf32> to vector<8x1xf32>
    %cst_7 = arith.constant 1.000000e-24 : f32
    %15 = vector.broadcast %cst_7 : f32 to vector<8x1xf32>
    %16 = arith.maximumf %14, %15 : vector<8x1xf32>
    %17 = math.rsqrt %16 : vector<8x1xf32>
    %18 = vector.broadcast %17 : vector<8x1xf32> to vector<8x32xf32>
    %19 = arith.mulf %11, %18 : vector<8x32xf32>
    %c0_8 = arith.constant 0 : index
    %c0_9 = arith.constant 0 : index
    %c0_10 = arith.constant 0 : index
    %20 = vector.load %arg3[%c0_8, %c0_9, %c0_10] : memref<1x40x32xf32, #tpu.memory_space<vmem>>, vector<1x40x32xf32>
    %21 = vector.shape_cast %20 : vector<1x40x32xf32> to vector<40x32xf32>
    %22 = arith.mulf %21, %21 : vector<40x32xf32>
    %cst_11 = arith.constant dense<0.000000e+00> : vector<40xf32>
    %23 = vector.multi_reduction <add>, %22, %cst_11 [1] : vector<40x32xf32> to vector<40xf32>
    %24 = vector.shape_cast %23 : vector<40xf32> to vector<40x1xf32>
    %cst_12 = arith.constant 1.000000e-24 : f32
    %25 = vector.broadcast %cst_12 : f32 to vector<40x1xf32>
    %26 = arith.maximumf %24, %25 : vector<40x1xf32>
    %27 = math.rsqrt %26 : vector<40x1xf32>
    %28 = vector.broadcast %27 : vector<40x1xf32> to vector<40x32xf32>
    %29 = arith.mulf %21, %28 : vector<40x32xf32>
    %cst_13 = arith.constant dense<0.000000e+00> : vector<16x8xf32>
    %30 = tpu.matmul %9, %19, %cst_13 {dimension_numbers = #tpu.dot_dimension_numbers<[1], [1], [0], [0], [0, 0, 1, 0], [], []>} : vector<16x32xf32>, vector<8x32xf32>, vector<16x8xf32> -> vector<16x8xf32>
    %cst_14 = arith.constant dense<0.000000e+00> : vector<16x40xf32>
    %31 = tpu.matmul %9, %29, %cst_14 {dimension_numbers = #tpu.dot_dimension_numbers<[1], [1], [0], [0], [0, 0, 1, 0], [], []>} : vector<16x32xf32>, vector<40x32xf32>, vector<16x40xf32> -> vector<16x40xf32>
    %32 = tpu.concatenate %30, %30, %31 in 1 : vector<16x8xf32>, vector<16x8xf32>, vector<16x40xf32> -> vector<16x56xf32>
    %c0_15 = arith.constant 0 : index
    %c0_16 = arith.constant 0 : index
    %33 = vector.load %arg5[%c0_15, %c0_16] : memref<168x96xf32, #tpu.memory_space<vmem>>, vector<168x96xf32>
    %c0_17 = arith.constant 0 : index
    %c0_18 = arith.constant 0 : index
    %34 = vector.load %arg6[%c0_17, %c0_18] : memref<1x96xf32, #tpu.memory_space<vmem>>, vector<1x96xf32>
    %35 = vector.extract_strided_slice %32 {offsets = [0, 0], sizes = [14, 56], strides = [1, 1]} : vector<16x56xf32> to vector<14x56xf32>
    %36 = vector.extract_strided_slice %32 {offsets = [1, 0], sizes = [14, 56], strides = [1, 1]} : vector<16x56xf32> to vector<14x56xf32>
    %37 = vector.extract_strided_slice %32 {offsets = [2, 0], sizes = [14, 56], strides = [1, 1]} : vector<16x56xf32> to vector<14x56xf32>
    %38 = tpu.concatenate %35, %36, %37 in 1 : vector<14x56xf32>, vector<14x56xf32>, vector<14x56xf32> -> vector<14x168xf32>
    %cst_19 = arith.constant dense<0.000000e+00> : vector<14x96xf32>
    %39 = tpu.matmul %38, %33, %cst_19 {dimension_numbers = #tpu.dot_dimension_numbers<[1], [0], [0], [1], [0, 0, 1, 1], [], []>} : vector<14x168xf32>, vector<168x96xf32>, vector<14x96xf32> -> vector<14x96xf32>
    %40 = vector.broadcast %34 : vector<1x96xf32> to vector<14x96xf32>
    %41 = arith.addf %39, %40 : vector<14x96xf32>
    %cst_20 = arith.constant 0.000000e+00 : f32
    %42 = vector.broadcast %cst_20 : f32 to vector<14x96xf32>
    %43 = arith.maximumf %41, %42 : vector<14x96xf32>
    %c0_21 = arith.constant 0 : index
    %c0_22 = arith.constant 0 : index
    %44 = vector.load %arg7[%c0_21, %c0_22] : memref<288x96xf32, #tpu.memory_space<vmem>>, vector<288x96xf32>
    %c0_23 = arith.constant 0 : index
    %c0_24 = arith.constant 0 : index
    %45 = vector.load %arg8[%c0_23, %c0_24] : memref<1x96xf32, #tpu.memory_space<vmem>>, vector<1x96xf32>
    %cst_25 = arith.constant 0.000000e+00 : f32
    %46 = vector.broadcast %cst_25 : f32 to vector<1x96xf32>
    %47 = tpu.concatenate %46, %43, %46 in 0 : vector<1x96xf32>, vector<14x96xf32>, vector<1x96xf32> -> vector<16x96xf32>
    %48 = vector.extract_strided_slice %47 {offsets = [0, 0], sizes = [14, 96], strides = [1, 1]} : vector<16x96xf32> to vector<14x96xf32>
    %49 = vector.extract_strided_slice %47 {offsets = [1, 0], sizes = [14, 96], strides = [1, 1]} : vector<16x96xf32> to vector<14x96xf32>
    %50 = vector.extract_strided_slice %47 {offsets = [2, 0], sizes = [14, 96], strides = [1, 1]} : vector<16x96xf32> to vector<14x96xf32>
    %51 = tpu.concatenate %48, %49, %50 in 1 : vector<14x96xf32>, vector<14x96xf32>, vector<14x96xf32> -> vector<14x288xf32>
    %cst_26 = arith.constant dense<0.000000e+00> : vector<14x96xf32>
    %52 = tpu.matmul %51, %44, %cst_26 {dimension_numbers = #tpu.dot_dimension_numbers<[1], [0], [0], [1], [0, 0, 1, 1], [], []>} : vector<14x288xf32>, vector<288x96xf32>, vector<14x96xf32> -> vector<14x96xf32>
    %53 = vector.broadcast %45 : vector<1x96xf32> to vector<14x96xf32>
    %54 = arith.addf %52, %53 : vector<14x96xf32>
    %55 = vector.extract_strided_slice %54 {offsets = [0, 0], sizes = [14, 16], strides = [1, 1]} : vector<14x96xf32> to vector<14x16xf32>
    %56 = vector.extract_strided_slice %54 {offsets = [0, 16], sizes = [14, 16], strides = [1, 1]} : vector<14x96xf32> to vector<14x16xf32>
    %57 = vector.extract_strided_slice %54 {offsets = [0, 32], sizes = [14, 64], strides = [1, 1]} : vector<14x96xf32> to vector<14x64xf32>
    %cst_27 = arith.constant dense<0xFF800000> : vector<14xf32>
    %58 = vector.multi_reduction <maximumf>, %55, %cst_27 [1] : vector<14x16xf32> to vector<14xf32>
    %59 = vector.shape_cast %58 : vector<14xf32> to vector<14x1xf32>
    %60 = arith.negf %59 : vector<14x1xf32>
    %61 = math.exp %60 : vector<14x1xf32>
    %cst_28 = arith.constant 1.000000e+00 : f32
    %62 = vector.broadcast %cst_28 : f32 to vector<14x1xf32>
    %63 = arith.addf %62, %61 : vector<14x1xf32>
    %64 = arith.divf %62, %63 : vector<14x1xf32>
    %cst_29 = arith.constant dense<0xFF800000> : vector<16xf32>
    %65 = vector.multi_reduction <maximumf>, %56, %cst_29 [0] : vector<14x16xf32> to vector<16xf32>
    %66 = vector.shape_cast %65 : vector<16xf32> to vector<1x16xf32>
    %cst_30 = arith.constant 0.000000e+00 : f32
    %67 = vector.broadcast %cst_30 : f32 to vector<1x16xf32>
    %68 = arith.maximumf %66, %67 : vector<1x16xf32>
    %cst_31 = arith.constant 0.000000e+00 : f32
    %69 = vector.broadcast %cst_31 : f32 to vector<14x64xf32>
    %70 = arith.maximumf %57, %69 : vector<14x64xf32>
    %71 = vector.broadcast %64 : vector<14x1xf32> to vector<14x64xf32>
    %72 = arith.mulf %70, %71 : vector<14x64xf32>
    %cst_32 = arith.constant dense<0xFF800000> : vector<64xf32>
    %73 = vector.multi_reduction <maximumf>, %72, %cst_32 [0] : vector<14x64xf32> to vector<64xf32>
    %74 = vector.shape_cast %73 : vector<64xf32> to vector<1x64xf32>
    %75 = vector.extract_strided_slice %74 {offsets = [0, 0], sizes = [1, 16], strides = [1, 1]} : vector<1x64xf32> to vector<1x16xf32>
    %76 = vector.extract_strided_slice %74 {offsets = [0, 16], sizes = [1, 16], strides = [1, 1]} : vector<1x64xf32> to vector<1x16xf32>
    %77 = vector.extract_strided_slice %74 {offsets = [0, 32], sizes = [1, 16], strides = [1, 1]} : vector<1x64xf32> to vector<1x16xf32>
    %78 = vector.extract_strided_slice %74 {offsets = [0, 48], sizes = [1, 16], strides = [1, 1]} : vector<1x64xf32> to vector<1x16xf32>
    %79 = tpu.concatenate %75, %76, %77, %78 in 0 : vector<1x16xf32>, vector<1x16xf32>, vector<1x16xf32>, vector<1x16xf32> -> vector<4x16xf32>
    %c0_33 = arith.constant 0 : index
    %c0_34 = arith.constant 0 : index
    %80 = vector.load %arg9[%c0_33, %c0_34] : memref<16x16xf32, #tpu.memory_space<vmem>>, vector<16x16xf32>
    %cst_35 = arith.constant dense<0.000000e+00> : vector<1x16xf32>
    %81 = tpu.matmul %68, %80, %cst_35 {dimension_numbers = #tpu.dot_dimension_numbers<[1], [0], [0], [1], [0, 0, 1, 1], [], []>} : vector<1x16xf32>, vector<16x16xf32>, vector<1x16xf32> -> vector<1x16xf32>
    %c0_36 = arith.constant 0 : index
    %c0_37 = arith.constant 0 : index
    %82 = vector.load %arg10[%c0_36, %c0_37] : memref<1x16xf32, #tpu.memory_space<vmem>>, vector<1x16xf32>
    %83 = arith.addf %81, %82 : vector<1x16xf32>
    %84 = arith.negf %83 : vector<1x16xf32>
    %85 = math.exp %84 : vector<1x16xf32>
    %cst_38 = arith.constant 1.000000e+00 : f32
    %86 = vector.broadcast %cst_38 : f32 to vector<1x16xf32>
    %87 = arith.addf %86, %85 : vector<1x16xf32>
    %88 = arith.divf %86, %87 : vector<1x16xf32>
    %c0_39 = arith.constant 0 : index
    %c0_40 = arith.constant 0 : index
    %89 = vector.load %arg11[%c0_39, %c0_40] : memref<16x16xf32, #tpu.memory_space<vmem>>, vector<16x16xf32>
    %cst_41 = arith.constant dense<0.000000e+00> : vector<4x16xf32>
    %90 = tpu.matmul %79, %89, %cst_41 {dimension_numbers = #tpu.dot_dimension_numbers<[1], [0], [0], [1], [0, 0, 1, 1], [], []>} : vector<4x16xf32>, vector<16x16xf32>, vector<4x16xf32> -> vector<4x16xf32>
    %c0_42 = arith.constant 0 : index
    %c0_43 = arith.constant 0 : index
    %91 = vector.load %arg12[%c0_42, %c0_43] : memref<1x16xf32, #tpu.memory_space<vmem>>, vector<1x16xf32>
    %92 = vector.broadcast %91 : vector<1x16xf32> to vector<4x16xf32>
    %93 = arith.addf %90, %92 : vector<4x16xf32>
    %cst_44 = arith.constant 0.000000e+00 : f32
    %94 = vector.broadcast %cst_44 : f32 to vector<4x16xf32>
    %95 = arith.maximumf %93, %94 : vector<4x16xf32>
    %96 = vector.broadcast %88 : vector<1x16xf32> to vector<4x16xf32>
    %97 = arith.mulf %96, %95 : vector<4x16xf32>
    %c0_45 = arith.constant 0 : index
    %c0_46 = arith.constant 0 : index
    %98 = vector.load %arg13[%c0_45, %c0_46] : memref<16x32xf32, #tpu.memory_space<vmem>>, vector<16x32xf32>
    %cst_47 = arith.constant dense<0.000000e+00> : vector<4x32xf32>
    %99 = tpu.matmul %97, %98, %cst_47 {dimension_numbers = #tpu.dot_dimension_numbers<[1], [0], [0], [1], [0, 0, 1, 1], [], []>} : vector<4x16xf32>, vector<16x32xf32>, vector<4x32xf32> -> vector<4x32xf32>
    %c0_48 = arith.constant 0 : index
    %c0_49 = arith.constant 0 : index
    %100 = vector.load %arg14[%c0_48, %c0_49] : memref<1x32xf32, #tpu.memory_space<vmem>>, vector<1x32xf32>
    %101 = vector.broadcast %100 : vector<1x32xf32> to vector<4x32xf32>
    %102 = arith.addf %99, %101 : vector<4x32xf32>
    %103 = math.tanh %102 : vector<4x32xf32>
    %c0_50 = arith.constant 0 : index
    %c0_51 = arith.constant 0 : index
    %c0_52 = arith.constant 0 : index
    %104 = vector.load %arg4[%c0_50, %c0_51, %c0_52] : memref<1x4x27xf32, #tpu.memory_space<vmem>>, vector<1x4x27xf32>
    %105 = vector.shape_cast %104 : vector<1x4x27xf32> to vector<4x27xf32>
    %106 = tpu.concatenate %103, %105 in 1 : vector<4x32xf32>, vector<4x27xf32> -> vector<4x59xf32>
    %c0_53 = arith.constant 0 : index
    %c0_54 = arith.constant 0 : index
    %107 = vector.load %arg15[%c0_53, %c0_54] : memref<1x59xf32, #tpu.memory_space<vmem>>, vector<1x59xf32>
    %cst_55 = arith.constant dense<0.000000e+00> : vector<1x4xf32>
    %108 = tpu.matmul %107, %106, %cst_55 {dimension_numbers = #tpu.dot_dimension_numbers<[1], [1], [0], [0], [0, 0, 1, 0], [], []>} : vector<1x59xf32>, vector<4x59xf32>, vector<1x4xf32> -> vector<1x4xf32>
    %c0_56 = arith.constant 0 : index
    %c0_57 = arith.constant 0 : index
    %109 = vector.load %arg16[%c0_56, %c0_57] : memref<1x1xf32, #tpu.memory_space<vmem>>, vector<1x1xf32>
    %110 = vector.broadcast %109 : vector<1x1xf32> to vector<1x4xf32>
    %111 = arith.addf %108, %110 : vector<1x4xf32>
    %cst_58 = arith.constant dense<0xFF800000> : vector<1xf32>
    %112 = vector.multi_reduction <maximumf>, %111, %cst_58 [1] : vector<1x4xf32> to vector<1xf32>
    %113 = vector.shape_cast %112 : vector<1xf32> to vector<1x1xf32>
    %114 = vector.broadcast %113 : vector<1x1xf32> to vector<1x4xf32>
    %115 = arith.subf %111, %114 : vector<1x4xf32>
    %116 = math.exp %115 : vector<1x4xf32>
    %cst_59 = arith.constant dense<0.000000e+00> : vector<1xf32>
    %117 = vector.multi_reduction <add>, %116, %cst_59 [1] : vector<1x4xf32> to vector<1xf32>
    %118 = vector.shape_cast %117 : vector<1xf32> to vector<1x1xf32>
    %119 = vector.broadcast %118 : vector<1x1xf32> to vector<1x4xf32>
    %120 = arith.divf %116, %119 : vector<1x4xf32>
    %c0_60 = arith.constant 0 : index
    %c0_61 = arith.constant 0 : index
    %c0_62 = arith.constant 0 : index
    %121 = vector.load %arg17[%c0_60, %c0_61, %c0_62] : memref<1x1x4xf32, #tpu.memory_space<vmem>>, vector<1x1x4xf32>
    %122 = vector.shape_cast %121 : vector<1x1x4xf32> to vector<1x4xf32>
    %123 = vector.shape_cast %120 : vector<1x4xf32> to vector<1x1x4xf32>
    tpu.vector_store %arg17[%c0_60, %c0_61, %c0_62], %123 {strides = array<i32>} : memref<1x1x4xf32, #tpu.memory_space<vmem>>, vector<1x1x4xf32>,
    return
  }
  func.func @transform_0(%arg0: i32) -> (i32, i32, i32) {
    %c0_i32 = arith.constant 0 : i32
    %c0_i32_0 = arith.constant 0 : i32
    %c0_i32_1 = arith.constant 0 : i32
    return %arg0, %c0_i32, %c0_i32_0 : i32, i32, i32
  }
  func.func @transform_1(%arg0: i32) -> (i32, i32, i32) {
    %c0_i32 = arith.constant 0 : i32
    %c0_i32_0 = arith.constant 0 : i32
    %c0_i32_1 = arith.constant 0 : i32
    return %arg0, %c0_i32, %c0_i32_0 : i32, i32, i32
  }
  func.func @transform_2(%arg0: i32) -> (i32, i32, i32) {
    %c0_i32 = arith.constant 0 : i32
    %c0_i32_0 = arith.constant 0 : i32
    %c0_i32_1 = arith.constant 0 : i32
    return %arg0, %c0_i32, %c0_i32_0 : i32, i32, i32
  }
  func.func @transform_3(%arg0: i32) -> (i32, i32, i32) {
    %c0_i32 = arith.constant 0 : i32
    %c0_i32_0 = arith.constant 0 : i32
    %c0_i32_1 = arith.constant 0 : i32
    return %arg0, %c0_i32, %c0_i32_0 : i32, i32, i32
  }
  func.func @transform_4(%arg0: i32) -> (i32, i32) {
    %c0_i32 = arith.constant 0 : i32
    %c0_i32_0 = arith.constant 0 : i32
    %c0_i32_1 = arith.constant 0 : i32
    return %c0_i32, %c0_i32_0 : i32, i32
  }
  func.func @transform_5(%arg0: i32) -> (i32, i32) {
    %c0_i32 = arith.constant 0 : i32
    %c0_i32_0 = arith.constant 0 : i32
    %c0_i32_1 = arith.constant 0 : i32
    return %c0_i32, %c0_i32_0 : i32, i32
  }
  func.func @transform_6(%arg0: i32) -> (i32, i32) {
    %c0_i32 = arith.constant 0 : i32
    %c0_i32_0 = arith.constant 0 : i32
    %c0_i32_1 = arith.constant 0 : i32
    return %c0_i32, %c0_i32_0 : i32, i32
  }
  func.func @transform_7(%arg0: i32) -> (i32, i32) {
    %c0_i32 = arith.constant 0 : i32
    %c0_i32_0 = arith.constant 0 : i32
    %c0_i32_1 = arith.constant 0 : i32
    return %c0_i32, %c0_i32_0 : i32, i32
  }
  func.func @transform_8(%arg0: i32) -> (i32, i32) {
    %c0_i32 = arith.constant 0 : i32
    %c0_i32_0 = arith.constant 0 : i32
    %c0_i32_1 = arith.constant 0 : i32
    return %c0_i32, %c0_i32_0 : i32, i32
  }
  func.func @transform_9(%arg0: i32) -> (i32, i32) {
    %c0_i32 = arith.constant 0 : i32
    %c0_i32_0 = arith.constant 0 : i32
    %c0_i32_1 = arith.constant 0 : i32
    return %c0_i32, %c0_i32_0 : i32, i32
  }
  func.func @transform_10(%arg0: i32) -> (i32, i32) {
    %c0_i32 = arith.constant 0 : i32
    %c0_i32_0 = arith.constant 0 : i32
    %c0_i32_1 = arith.constant 0 : i32
    return %c0_i32, %c0_i32_0 : i32, i32
  }
  func.func @transform_11(%arg0: i32) -> (i32, i32) {
    %c0_i32 = arith.constant 0 : i32
    %c0_i32_0 = arith.constant 0 : i32
    %c0_i32_1 = arith.constant 0 : i32
    return %c0_i32, %c0_i32_0 : i32, i32
  }
  func.func @transform_12(%arg0: i32) -> (i32, i32) {
    %c0_i32 = arith.constant 0 : i32
    %c0_i32_0 = arith.constant 0 : i32
    %c0_i32_1 = arith.constant 0 : i32
    return %c0_i32, %c0_i32_0 : i32, i32
  }
  func.func @transform_13(%arg0: i32) -> (i32, i32) {
    %c0_i32 = arith.constant 0 : i32
    %c0_i32_0 = arith.constant 0 : i32
    %c0_i32_1 = arith.constant 0 : i32
    return %c0_i32, %c0_i32_0 : i32, i32
  }
  func.func @transform_14(%arg0: i32) -> (i32, i32) {
    %c0_i32 = arith.constant 0 : i32
    %c0_i32_0 = arith.constant 0 : i32
    %c0_i32_1 = arith.constant 0 : i32
    return %c0_i32, %c0_i32_0 : i32, i32
  }
  func.func @transform_15(%arg0: i32) -> (i32, i32) {
    %c0_i32 = arith.constant 0 : i32
    %c0_i32_0 = arith.constant 0 : i32
    %c0_i32_1 = arith.constant 0 : i32
    return %c0_i32, %c0_i32_0 : i32, i32
  }
  func.func @transform_16(%arg0: i32) -> (i32, i32, i32) {
    %c0_i32 = arith.constant 0 : i32
    %c0_i32_0 = arith.constant 0 : i32
    %c0_i32_1 = arith.constant 0 : i32
    return %arg0, %c0_i32, %c0_i32_0 : i32, i32, i32
  }
}

</mosaic_0001>

<bundles_post_ra>
// kernel: tpu_custom_call.1
= control target key start
LH: loop header
LB: loop body
LE: loop exit
PB: predicated region body
PF: predicated region fallthrough
CT: control target
= control target key end

     0   :  { %s2180_s0 = inlined_call_operand.vmem [shape: f32[2,16,32], index: 0, kind: input, shape index: {}]   ;;  %s2181_s1 = inlined_call_operand.vmem [shape: f32[2,8,32], index: 1, kind: input, shape index: {}]   ;;  %s2182_s2 = inlined_call_operand.vmem [shape: f32[2,40,32], index: 2, kind: input, shape index: {}]   ;;  %s2183_s3 = inlined_call_operand.vmem [shape: f32[2,4,27], index: 3, kind: input, shape index: {}]   ;;  %s2184_s4 = inlined_call_operand.hbm [shape: f32[168,96], index: 4, kind: input, shape index: {}]   ;;  %s2185_s5 = inlined_call_operand.vmem [shape: f32[1,96], index: 5, kind: input, shape index: {}]   ;;  %s2186_s6 = inlined_call_operand.hbm [shape: f32[288,96], index: 6, kind: input, shape index: {}]   ;;  %s2187_s7 = inlined_call_operand.vmem [shape: f32[1,96], index: 7, kind: input, shape index: {}]   ;;  %s2188_s8 = inlined_call_operand.vmem [shape: f32[16,16], index: 8, kind: input, shape index: {}]   ;;  %s2189_s9 = inlined_call_operand.vmem [shape: f32[1,16], index: 9, kind: input, shape index: {}]   ;;  %s2190_s10 = inlined_call_operand.vmem [shape: f32[16,16], index: 10, kind: input, shape index: {}]   ;;  %s2191_s11 = inlined_call_operand.vmem [shape: f32[1,16], index: 11, kind: input, shape index: {}]   ;;  %s2192_s12 = inlined_call_operand.vmem [shape: f32[16,32], index: 12, kind: input, shape index: {}]   ;;  %s2193_s13 = inlined_call_operand.vmem [shape: f32[1,32], index: 13, kind: input, shape index: {}]   ;;  %s2194_s14 = inlined_call_operand.vmem [shape: f32[1,59], index: 14, kind: input, shape index: {}]   ;;  %s2195_s15 = inlined_call_operand.<no memory space> [shape: f32[1,1], index: 15, kind: input, shape index: {}]   ;;  %s2196_s16 = inlined_call_operand.hbm [shape: f32[2,1,4], index: 16, kind: output, shape index: {}]  }
   0x1   :  { %2202 = sst [smem:[#allocation17_spill]] %s2180_s0  ;;  %v21_v0 = vstv %s2195_s15 }
   0x2   :  { %22 = vst [vmem:[#allocation2] sm:$0x1] %v21_v0 }
   0x3   :  { %23 = vsyncpa [#allocation4], 0 }
   0x4   :  { %24 = vsyncpa [#allocation7], 0 }
   0x5   :  { %25 = vsyncpa [#allocation5], 0 }
   0x6   :  { %27 = vsyncpa [#allocation5 + $0x1], 0  ;;  %s1866_s23 = smov 0   ;;  %s1868_s24 = smov 0  }
   0x7   :  { %s1870_s25 = smov 0   ;;  %s1872_s26 = smov 0  }
   0x8 LB: > { %2203 = sst [smem:[#allocation12_spill]] %s1751_s23  ;;  %s1887_s15 = sadd.s32 4294967295, %s1763_s26   ;;  %s1763_s26 = sphi %s1872_s26, %s2216_s26   ;;  %s1759_s25 = sphi %s1870_s25, %s2218_s25   ;;  %s1755_s24 = sphi %s1868_s24, %s2220_s24   ;;  %s1751_s23 = sphi %s1866_s23, %s2219_s23  }
   0x9   : > { %2204 = sst [smem:[#allocation13_spill]] %s1759_s25  ;;  %s1484_s27 = sadd.s32 4294967294, %s1763_s26  }
   0xa   : > { %s1891_s28 = sadd.s32 1, %s1763_s26   ;;  %s396_s29 = sadd.s32 1, %s1759_s25 }
   0xb   : > { %2205 = sst [smem:[#allocation14_spill]] %s1891_s28  ;;  %s393_s30 = ssub.s32 %s1763_s26, %s1891_s28 }
   0xc   : > { %p406_p0 = scmp.ne.s32.totalorder %s1759_s25, %s1755_s24  ;;  %p394_p1 = scmp.eq.s32.totalorder %s393_s30, 0 }
   0xd   : > { %p407_p2 = scmp.eq.s32.totalorder %s1887_s15, 1  ;;  %p412_p3 = scmp.ne.s32.totalorder %s1755_s24, %s1751_s23 }
   0xe   : > { %p413_p4 = scmp.eq.s32.totalorder %s1484_s27, 1  ;;  %p1485_p7 = scmp.ge.s32.totalorder %s1763_s26, 1 }
   0xf   : > { %s1902_s0 = scalar_select %p394_p1, %s1759_s25, %s396_s29  }
  0x10   : > { %p1904_p5 = por %p407_p2, %p406_p0  ;;  %p1908_p6 = por %p413_p4, %p412_p3 }
  0x11   : > { %2206 = sst [smem:[#allocation15_spill]] %s1902_s0  ;;  %p420_p8 = scmp.lt.s32.totalorder %s1763_s26, 3 }
  0x12   : > { %s2208_s18 = scalar_select %p1908_p6, 1, 0 }
  0x13   : > { %p1544_p9 = scmp.eq.s32.totalorder %s1887_s15, 0  ;;  %p1915_p10 = pnand %p1485_p7, %p420_p8 }
  0x14   : > { %2209 = sst [smem:[#allocation16_spill]] %s2208_s18  ;;  %s431_s22 = sshll.u32 %s2184_s4, 4  ;;  %s432_s22 = int_to_ptr.hbm [resolvable:$true] %s431_s22 }
  0x15   : > { %p1533_p11 = pneg %p1915_p10  ;;  %s1765_s27 = smov [#allocation3]  }
  0x16   : > { %s433_s29 = sshll.u32 %s1765_s27, 4  ;;  %s448_s25 = sshll.u32 %s2186_s6, 4  ;;  %s434_s29 = int_to_ptr.vmem [resolvable:$true] %s433_s29  ;;  %s449_s25 = int_to_ptr.hbm [resolvable:$true] %s448_s25 }
  0x17   : > { %p1534_p12 = pnand %p1544_p9, %p1533_p11  ;;  %s1766_s28 = smov 128  }
  0x18   : > { %s1767_s18 = smov 8   ;;  %s1768_s23 = smov [#allocation6]  }
  0x19   : > { %1536 = dma.hbm_to_vmem [thread:$0]  (!%p1534_p12), %s432_s22, 2688, %s434_s29, [#allocation4], %s1766_s28, %s1766_s28, %s1767_s18  }
  0x1a   : > { %s450_s20 = sshll.u32 %s1768_s23, 4  ;;  %523 = sbr.rel (%p1915_p10) target bundleno = 2017 (0x7e1), region = 84  ;;  %s451_s20 = int_to_ptr.vmem [resolvable:$true] %s450_s20 }
  0x1b   : > { %1539 = dma.hbm_to_vmem [thread:$0]  (!%p1534_p12), %s449_s25, 4608, %s451_s20, [#allocation7], %s1766_s28, %s1766_s28, %s1767_s18  }
  0x1f   : > { %1738 = dma.done.wait (%p1544_p9), [#allocation4], 2688  }
  0x20   : > { %1740 = vsyncadd (%p1544_p9), [#allocation4], 4294964608 }
  0x21   : > { %1742 = dma.done.wait (%p1544_p9), [#allocation7], 4608  }
  0x22   : > { %1744 = vsyncadd (%p1544_p9), [#allocation7], 4294962688  ;;  %p591_p13 = scmp.lt.s32.totalorder %s1887_s15, 1  ;;  %vm613_vm0 = vcmask 261120   ;;  %s1769_s0 = smov 8  }
  0x23   : > { %s1770_s18 = smov 16   ;;  %s1772_s21 = smov 112  }
  0x24   : > { %s1941_s23 = scalar_select %p591_p13, %s1887_s15, 1 }
  0x25   : > { %s1774_s30 = smov 64  }
  0x26   : > { %s1522_s25 = smul.u32 40, %s1941_s23  ;;  %s1494_s28 = sshll.u32 %s1941_s23, 3 }
  0x27   : > { %s599_s19 = scalar_lea.vmem %s2181_s1, %s1494_s28  ;;  %s1521_s29 = sshll.u32 %s1941_s23, 4 }
  0x28   : > { %s604_s27 = scalar_lea.vmem %s2182_s2, %s1522_s25  ;;  %v1955_v3 = vld [vmem:[%s599_s19] sm:$0xff]  ;;  %s2211_s25 = sld [smem:[#allocation17_spill]] }
  0x29   : > { %v1951_v1 = vld [vmem:[%s604_s27 + $0x20] sm:$0xff]  ;;  %v1953_v2 = vld [vmem:[%s604_s27 + $0x10] sm:$0xff]  ;;  %v645_v6 = vmul.f32 %v1955_v3, %v1955_v3  ;;  %v1963_v7 = vld [vmem:[%s604_s27 + $0x18] sm:$0xff]  ;;  %s1771_s19 = smov 56  }
  0x2a   : > { %v670_v4 = vmul.f32 %v1951_v1, %v1951_v1  ;;  %v668_v5 = vmul.f32 %v1953_v2, %v1953_v2  ;;  %v1965_v8 = vld [vmem:[%s604_s27 + $0x8] sm:$0xff]  ;;  %v1970_v12 = vld [vmem:[%s604_s27] sm:$0xff]  ;;  %v669_v13 = vmul.f32 %v1963_v7, %v1963_v7 }
  0x2b   : > { %v646_v11 = vsel %vm613_vm0, %v645_v6, 0.0  ;;  %v667_v14 = vmul.f32 %v1965_v8, %v1965_v8  ;;  %v666_v15 = vmul.f32 %v1970_v12, %v1970_v12 }
  0x2c   : > { %v683_v9 = vsel %vm613_vm0, %v670_v4, 0.0  ;;  %v677_v10 = vsel %vm613_vm0, %v668_v5, 0.0  ;;  %647 = vadd.xlane.f32.xlu2 %v646_v11  ;;  %v680_v16 = vsel %vm613_vm0, %v669_v13, 0.0 }
  0x2d   : > { %684 = vadd.xlane.f32.xlu0 %v683_v9  ;;  %678 = vadd.xlane.f32.xlu1 %v677_v10  ;;  %v674_v17 = vsel %vm613_vm0, %v667_v14, 0.0  ;;  %v671_v18 = vsel %vm613_vm0, %v666_v15, 0.0 }
  0x2e   : > { %s595_s28 = scalar_lea.vmem %s2211_s25, %s1521_s29  ;;  %s1773_s29 = smov 96  }
  0x2f   : > { %v1985_v19 = vld [vmem:[%s595_s28 + $0x8] sm:$0xff]  ;;  %v1987_v20 = vld [vmem:[%s595_s28] sm:$0xff]  ;;  %s1775_s28 = smov 80   ;;  %s1776_s25 = smov 32  }
  0x30   : > { %v612_v21 = vmul.f32 %v1985_v19, %v1985_v19  ;;  %v611_v22 = vmul.f32 %v1987_v20, %v1987_v20 }
  0x32   : > { %v617_v23 = vsel %vm613_vm0, %v612_v21, 0.0  ;;  %v614_v24 = vsel %vm613_vm0, %v611_v22, 0.0 }
  0x34   : > { %672 = vadd.xlane.f32.xlu2 %v671_v18 }
  0x35   : > { %681 = vadd.xlane.f32.xlu0 %v680_v16  ;;  %675 = vadd.xlane.f32.xlu1 %v674_v17 }
  0x3d   : > { %618 = vadd.xlane.f32.xlu1 %v617_v23  ;;  %615 = vadd.xlane.f32.xlu0 %v614_v24 }
  0x9f   : > { %v648_v29 = vpop.xlane.xlu2 %647 }
  0xa0   : > { %v685_v25 = vpop.xlane.xlu0 %684  ;;  %v679_v26 = vpop.xlane.xlu1 %678  ;;  %v649_v30 = vmax.f32 %v648_v29, 1e-24 }
  0xa1   : > { %v690_v27 = vmax.f32 %v685_v25, 1e-24  ;;  %v1995_v28 = vmax.f32 %v679_v26, 1e-24 }
  0xa2   : > { %vm656_vm3 = vweird.f32 %v649_v30 }
  0xa3   : > { %1599 = vrsqrt.f32 %v690_v27  ;;  %vm737_vm2 = vweird.f32 %v690_v27  ;;  %vm717_vm8 = vweird.f32 %v1995_v28 }
  0xa4   : > { %1601 = vrsqrt.f32 %v1995_v28 }
  0xa5   : > { %1603 = vrsqrt.f32 %v649_v30 }
  0xa7   : > { %v673_v36 = vpop.xlane.xlu2 %672 }
  0xa8   : > { %v682_v31 = vpop.xlane.xlu0 %681  ;;  %v676_v32 = vpop.xlane.xlu1 %675  ;;  %v2004_v39 = vmax.f32 %v673_v36, 1e-24 }
  0xa9   : > { %v1600_v33 = vpop.eup %1599  ;;  %v1998_v34 = vmax.f32 %v682_v31, 1e-24  ;;  %v2000_v35 = vmax.f32 %v676_v32, 1e-24 }
  0xaa   : > { %v2002_v37 = vpop.eup %1601  ;;  %v732_v38 = vmul.f32 %v1600_v33, %v690_v27  ;;  %vm738_vm1 = vweird.f32 %v1600_v33  ;;  %vm697_vm15 = vweird.f32 %v2004_v39 }
  0xab   : > { %v1604_v40 = vpop.eup %1603  ;;  %v712_v41 = vmul.f32 %v2002_v37, %v1995_v28  ;;  %1605 = vrsqrt.f32 %v1998_v34  ;;  %vm739_vm5 = vmor %vm737_vm2, %vm738_vm1  ;;  %vm718_vm9 = vweird.f32 %v2002_v37  ;;  %vm727_vm10 = vweird.f32 %v1998_v34 }
  0xac   : > { %v733_v42 = vmul.f32 %v1600_v33, %v732_v38  ;;  %v651_v43 = vmul.f32 %v1604_v40, %v649_v30  ;;  %1607 = vrsqrt.f32 %v2000_v35  ;;  %vm657_vm4 = vweird.f32 %v1604_v40  ;;  %vm2039_vm12 = vmor %vm717_vm8, %vm718_vm9 }
  0xad   : > { %v713_v44 = vmul.f32 %v2002_v37, %v712_v41  ;;  %1609 = vrsqrt.f32 %v2004_v39  ;;  %vm658_vm6 = vmor %vm656_vm3, %vm657_vm4  ;;  %vm707_vm13 = vweird.f32 %v2000_v35 }
  0xae   : > { %v734_v45 = vmul.f32 0.5, %v733_v42  ;;  %v652_v46 = vmul.f32 %v1604_v40, %v651_v43 }
  0xaf   : > { %v714_v52 = vmul.f32 0.5, %v713_v44 }
  0xb0   : > { %v735_v47 = vsub.f32 1.5, %v734_v45  ;;  %v653_v48 = vmul.f32 0.5, %v652_v46  ;;  %v619_v49 = vpop.xlane.xlu1 %618  ;;  %v616_v50 = vpop.xlane.xlu0 %615 }
  0xb1   : > { %v1606_v51 = vpop.eup %1605  ;;  %v2012_v53 = vmax.f32 %v619_v49, 1e-24  ;;  %v2014_v54 = vmax.f32 %v616_v50, 1e-24  ;;  %v715_v63 = vsub.f32 1.5, %v714_v52  ;;  %v853_v49 = vld [vmem:[#allocation3 + $0x78] sm:$0xff] }
  0xb2   : > { %v2016_v55 = vpop.eup %1607  ;;  %v654_v56 = vsub.f32 1.5, %v653_v48  ;;  %v722_v57 = vmul.f32 %v1606_v51, %v1998_v34  ;;  %v736_v58 = vmul.f32 %v1600_v33, %v735_v47  ;;  %vm728_vm7 = vweird.f32 %v1606_v51  ;;  %v858_v47 = vld [vmem:[#allocation3 + $0xa0] sm:$0xff]  ;;  %v857_v48 = vld [vmem:[#allocation3 + $0x98] sm:$0xff]  ;;  %896 = vmatpush.msra.mxu2 %v853_v49  ;;  %v856_v50 = vld [vmem:[#allocation3 + $0x90] sm:$0xff] }
  0xb3   : > { %v2019_v59 = vpop.eup %1609  ;;  %v702_v60 = vmul.f32 %v2016_v55, %v2000_v35  ;;  %1611 = vrsqrt.f32 %v2012_v53  ;;  %v716_v17 = vmul.f32 %v2002_v37, %v715_v63  ;;  %vm729_vm11 = vmor %vm727_vm10, %vm728_vm7  ;;  %vm708_vm14 = vweird.f32 %v2016_v55  ;;  %930 = vmatpush.msra.mxu3 %v858_v47  ;;  %v855_v52 = vld [vmem:[#allocation3 + $0x88] sm:$0xff] }
  0xb4   : > { %v723_v61 = vmul.f32 %v1606_v51, %v722_v57  ;;  %v692_v62 = vmul.f32 %v2019_v59, %v2004_v39  ;;  %1613 = vrsqrt.f32 %v2014_v54  ;;  %v655_v4 = vmul.f32 %v1604_v40, %v654_v56  ;;  %vm709_vm2 = vmor %vm707_vm13, %vm708_vm14 }
  0xb5   : > { %v703_v0 = vmul.f32 %v2016_v55, %v702_v60  ;;  %v740_v5 = vsel %vm739_vm5, %v1600_v33, %v736_v58  ;;  %v720_v30 = vsel %vm2039_vm12, %v2002_v37, %v716_v17  ;;  %vm698_vm1 = vweird.f32 %v2019_v59  ;;  %931 = vmatpush.msra.mxu3 %v857_v48  ;;  %v843_v17 = vld [vmem:[#allocation3 + $0x28] sm:$0xff]  ;;  %v951_v48 = vld [vmem:[#allocation6 + $0x38] sm:$0xff] }
  0xb6   : > { %v724_v6 = vmul.f32 0.5, %v723_v61  ;;  %v693_v9 = vmul.f32 %v2019_v59, %v692_v62  ;;  %v745_v10 = vmul.f32 %v740_v5, %v1951_v1  ;;  %v659_v13 = vsel %vm658_vm6, %v1604_v40, %v655_v4  ;;  %vm699_vm4 = vmor %vm697_vm15, %vm698_vm1 }
  0xb7   : > { %v704_v11 = vmul.f32 0.5, %v703_v0  ;;  %v660_v15 = vmul.f32 %v659_v13, %v1955_v3  ;;  %vm628_vm5 = vweird.f32 %v2014_v54  ;;  %vm638_vm7 = vweird.f32 %v2012_v53  ;;  %932 = vmatpush.msra.mxu3 %v856_v50  ;;  %v847_v13 = vld [vmem:[#allocation3 + $0x48] sm:$0xff] }
  0xb8   : > { %v725_v14 = vsub.f32 1.5, %v724_v6  ;;  %1500 = vmatpush.xpose.msk.msra.mxu1 %vm613_vm0, %v745_v10  ;;  %v694_v1 = vmul.f32 0.5, %v693_v9  ;;  %vm832_vm10 = vcmask 64512   ;;  %vm872_vm12 = vcmask 1045504   ;;  %v850_v9 = vld [vmem:[#allocation3 + $0x60] sm:$0xff]  ;;  %v849_v10 = vld [vmem:[#allocation3 + $0x58] sm:$0xff] }
  0xb9   : > { %v1612_v16 = vpop.eup %1611  ;;  %v705_v21 = vsub.f32 1.5, %v704_v11  ;;  %1497 = vmatpush.xpose.msk.msra.mxu0 %vm613_vm0, %v660_v15  ;;  %933 = vmatpush.msra.mxu3 %v855_v52  ;;  %vm862_vm13 = vcmask 1046528   ;;  %v848_v11 = vld [vmem:[#allocation3 + $0x50] sm:$0xff]  ;;  %v845_v15 = vld [vmem:[#allocation3 + $0x38] sm:$0xff]  ;;  %vm891_vm14 = vcmask 326656   ;;  %vm882_vm15 = vcmask 457728  }
  0xba   : > { %v1614_v18 = vpop.eup %1613  ;;  %v633_v22 = vmul.f32 %v1612_v16, %v2012_v53  ;;  %v726_v23 = vmul.f32 %v1606_v51, %v725_v14  ;;  %v695_v29 = vsub.f32 1.5, %v694_v1  ;;  %vm639_vm8 = vweird.f32 %v1612_v16  ;;  %v854_v53 = vld [vmem:[#allocation3 + $0x80] sm:$0xff]  ;;  %v840_v1 = vld [vmem:[#allocation3 + $0x10] sm:$0xff] }
  0xbb   : > { %v623_v3 = vmul.f32 %v1614_v18, %v2014_v54  ;;  %v706_v31 = vmul.f32 %v2016_v55, %v705_v21  ;;  %vm629_vm3 = vweird.f32 %v1614_v18  ;;  %vm640_vm9 = vmor %vm638_vm7, %vm639_vm8  ;;  %934 = vmatpush.msra.mxu3 %v854_v53  ;;  %v846_v14 = vld [vmem:[#allocation3 + $0x40] sm:$0xff]  ;;  %v841_v21 = vld [vmem:[#allocation3 + $0x18] sm:$0xff]  ;;  %vm885_vm1 = vcmask 916480  }
  0xbc   : > { %v634_v24 = vmul.f32 %v1612_v16, %v633_v22  ;;  %v730_v25 = vsel %vm729_vm11, %v1606_v51, %v726_v23  ;;  %v696_v36 = vmul.f32 %v2019_v59, %v695_v29  ;;  %vm630_vm6 = vmor %vm628_vm5, %vm629_vm3  ;;  %v851_v51 = vld [vmem:[#allocation3 + $0x68] sm:$0xff]  ;;  %vm835_vm11 = vcmask 130048   ;;  %v838_v23 = vld [vmem:[#allocation3] sm:$0xff] }
  0xbd   : > { %v624_v27 = vmul.f32 %v1614_v18, %v623_v3  ;;  %v744_v28 = vmul.f32 %v730_v25, %v1963_v7  ;;  %v743_v7 = vmul.f32 %v720_v30, %v1953_v2  ;;  %v710_v35 = vsel %vm709_vm2, %v2016_v55, %v706_v31  ;;  %v839_v22 = vld [vmem:[#allocation3 + $0x8] sm:$0xff]  ;;  %v1595_v31 = vld [vmem:[%s2185_s5] ss:$0 sm:$0xff]  ;;  %v949_v52 = vld [vmem:[#allocation6 + $0x28] sm:$0xff] }
  0xbe   : > { %v635_v32 = vmul.f32 0.5, %v634_v24  ;;  %v742_v40 = vmul.f32 %v710_v35, %v1965_v8  ;;  %v700_v42 = vsel %vm699_vm4, %v2019_v59, %v696_v36  ;;  %vm983_vm2 = vcmask 1040384  }
  0xbf   : > { %v625_v33 = vmul.f32 0.5, %v624_v27  ;;  %1501 = vmatpush.xpose.msk.msra.mxu1 %vm613_vm0, %v744_v28  ;;  %v741_v43 = vmul.f32 %v700_v42, %v1970_v12  ;;  %v973_v42 = vld [vmem:[#allocation6 + $0xe8] sm:$0xff]  ;;  %vm1011_vm3 = vcmask 785408   ;;  %vm1014_vm4 = vcmask 523264  }
  0xc0   : > { %v636_v37 = vsub.f32 1.5, %v635_v32  ;;  %v959_v32 = vld [vmem:[#allocation6 + $0x78] sm:$0xff]  ;;  %vm1138_vm5 = vcmask 261248   ;;  %vm1096_vm7 = vcmask 128000  }
  0xc1   : > { %v626_v34 = vsub.f32 1.5, %v625_v33  ;;  %v958_v33 = vld [vmem:[#allocation6 + $0x70] sm:$0xff]  ;;  %1024 = vmatpush.msrb.mxu0 %v959_v32 }
  0xc2   : > { %v637_v2 = vmul.f32 %v1612_v16, %v636_v37  ;;  %v956_v37 = vld [vmem:[#allocation6 + $0x60] sm:$0xff] }
  0xc3   : > { %1502 = vmatpush.xpose.msk.msra.mxu1 %vm613_vm0, %v743_v7  ;;  %v627_v38 = vmul.f32 %v1614_v18, %v626_v34  ;;  %v957_v7 = vld [vmem:[#allocation6 + $0x68] sm:$0xff]  ;;  %1025 = vmatpush.msrb.mxu0 %v958_v33  ;;  %v1596_v33 = vld [vmem:[%s2187_s7] ss:$0 sm:$0xff] }
  0xc4   : > { %v641_v44 = vsel %vm640_vm9, %v1612_v16, %v637_v2  ;;  %v844_v16 = vld [vmem:[#allocation3 + $0x30] sm:$0xff]  ;;  %v954_v2 = vld [vmem:[#allocation6 + $0x50] sm:$0xff] }
  0xc5   : > { %v631_v39 = vsel %vm630_vm6, %v1614_v18, %v627_v38  ;;  %v643_v8 = vmul.f32 %v641_v44, %v1985_v19  ;;  %v852_v19 = vld [vmem:[#allocation3 + $0x70] sm:$0xff]  ;;  %v842_v18 = vld [vmem:[#allocation3 + $0x20] sm:$0xff]  ;;  %1026 = vmatpush.msrb.mxu0 %v957_v7  ;;  %vm1140_vm6 = vcmask 259200  }
  0xc6   : > { %v642_v41 = vmul.f32 %v631_v39, %v1987_v20  ;;  %897 = vmatpush.msra.mxu2 %v852_v19  ;;  %v975_v38 = vld [vmem:[#allocation6 + $0xf8] sm:$0xff]  ;;  %v974_v39 = vld [vmem:[#allocation6 + $0xf0] sm:$0xff] }
  0xc7   : > { %1503 = vmatpush.xpose.msk.msra.mxu1 %vm613_vm0, %v742_v40  ;;  %1047 = vmatpush.msrb.mxu3 %v975_v38  ;;  %v950_v19 = vld [vmem:[#allocation6 + $0x30] sm:$0xff] }
  0xc8   : > { %1498 = vmatmul.msk.f32.vlgmr.msra.gmra.mxu0 %vm613_vm0, %v642_v41  ;;  %898 = vmatpush.msra.mxu2 %v851_v51 }
  0xc9   : > { %1027 = vmatpush.msrb.mxu0 %v956_v37  ;;  %1048 = vmatpush.msrb.mxu3 %v974_v39 }
  0xca   : > { %899 = vmatpush.msra.mxu2 %v850_v9  ;;  %v970_v9 = vld [vmem:[#allocation6 + $0xd0] sm:$0xff] }
  0xcb   : > { %1504 = vmatpush.xpose.msk.msra.mxu1 %vm613_vm0, %v741_v43  ;;  %1049 = vmatpush.msrb.mxu3 %v973_v42 }
  0xcc   : > { %900 = vmatpush.msra.mxu2 %v849_v10  ;;  %v969_v10 = vld [vmem:[#allocation6 + $0xc8] sm:$0xff] }
  0xce   : > { %1505 = vmatmul.msk.f32.vlgmr.msra.gmra.mxu1 %vm613_vm0, %v642_v41  ;;  %901 = vmatpush.msra.mxu2 %v848_v11  ;;  %v955_v41 = vld [vmem:[#allocation6 + $0x58] sm:$0xff]  ;;  %v968_v11 = vld [vmem:[#allocation6 + $0xc0] sm:$0xff] }
  0xcf   : > { %1028 = vmatpush.msrb.mxu0 %v955_v41 }
  0xd0   : > { %1499 = vmatmul.msk.f32.gmra.mxu0 %vm613_vm0, %v643_v8  ;;  %902 = vmatpush.msra.mxu2 %v847_v13  ;;  %v967_v13 = vld [vmem:[#allocation6 + $0xb8] sm:$0xff] }
  0xd1   : > { %1029 = vmatpush.msrb.mxu0 %v954_v2 }
  0xd2   : > { %903 = vmatpush.msra.mxu2 %v846_v14  ;;  %v979_v14 = vld [vmem:[#allocation6 + $0x118] sm:$0xff] }
  0xd3   : > { %1082 = vmatpush.msrb.mxu1 %v979_v14 }
  0xd4   : > { %904 = vmatpush.msra.mxu2 %v845_v15  ;;  %v966_v15 = vld [vmem:[#allocation6 + $0xb0] sm:$0xff] }
  0xd6   : > { %1506 = vmatmul.msk.f32.gmra.mxu1 %vm613_vm0, %v643_v8  ;;  %905 = vmatpush.msra.mxu2 %v844_v16  ;;  %v953_v8 = vld [vmem:[#allocation6 + $0x48] sm:$0xff]  ;;  %v978_v16 = vld [vmem:[#allocation6 + $0x110] sm:$0xff] }
  0xd7   : > { %1030 = vmatpush.msrb.mxu0 %v953_v8  ;;  %1083 = vmatpush.msrb.mxu1 %v978_v16 }
  0xd8   : > { %906 = vmatpush.msra.mxu2 %v843_v17  ;;  %v977_v17 = vld [vmem:[#allocation6 + $0x108] sm:$0xff] }
  0xd9   : > { %1084 = vmatpush.msrb.mxu1 %v977_v17 }
  0xda   : > { %907 = vmatpush.msra.mxu2 %v842_v18  ;;  %v965_v18 = vld [vmem:[#allocation6 + $0xa8] sm:$0xff] }
  0xdc   : > { %908 = vmatpush.msra.mxu2 %v841_v21  ;;  %v964_v21 = vld [vmem:[#allocation6 + $0xa0] sm:$0xff] }
  0xde   : > { %909 = vmatpush.msra.mxu2 %v840_v1  ;;  %v963_v1 = vld [vmem:[#allocation6 + $0x98] sm:$0xff] }
  0xe0   : > { %910 = vmatpush.msra.mxu2 %v839_v22  ;;  %v962_v22 = vld [vmem:[#allocation6 + $0x90] sm:$0xff] }
  0xe2   : > { %911 = vmatpush.msra.mxu2 %v838_v23  ;;  %v961_v23 = vld [vmem:[#allocation6 + $0x88] sm:$0xff] }
 0x145   : > { %v772_v20 = vpop.f32.mrf.mxu0 }
 0x146   : > { %818 = vrot.lane.b32.xlu2 %v772_v20, %s1769_s0 }
 0x14b   : > { %v810_v45 = vpop.f32.mrf.mxu1 }
 0x14c   : > { %826 = vrot.lane.b32.xlu1 %v810_v45, %s1770_s18 }
 0x14d   : > { %v775_v46 = vpop.f32.mrf.mxu0 }
 0x14e   : > { %820 = vrot.lane.b32.xlu0 %v775_v46, %s1769_s0 }
 0x153   : > { %v813_v12 = vpop.f32.mrf.mxu1 }
 0x154   : > { %828 = vrot.lane.b32.xlu2 %v813_v12, %s1770_s18 }
 0x1a0   : > { %v819_v54 = vpop.permute.xlu2 %818 }
 0x1a1   : > { %v833_v56 = vsel %vm832_vm10, %v772_v20, %v819_v54 }
 0x1ae   : > { %v829_v59 = vpop.permute.xlu2 %828 }
 0x1be   : > { %v827_v55 = vpop.permute.xlu1 %826 }
 0x1bf   : > { %v836_v57 = vsel %vm835_vm11, %v833_v56, %v827_v55  ;;  %v948_v55 = vld [vmem:[#allocation6 + $0x20] sm:$0xff] }
 0x1c0   : > { %v821_v58 = vpop.permute.xlu0 %820  ;;  %v863_v62 = vrot.slane %v836_v57, 1  ;;  %v873_v63 = vrot.slane %v836_v57, 2 }
 0x1c1   : > { %v834_v60 = vsel %vm832_vm10, %v775_v46, %v821_v58  ;;  %v952_v46 = vld [vmem:[#allocation6 + $0x40] sm:$0xff] }
 0x1c2   : > { %v837_v61 = vsel %vm835_vm11, %v834_v60, %v829_v59  ;;  %1031 = vmatpush.msrb.mxu0 %v952_v46  ;;  %v947_v60 = vld [vmem:[#allocation6 + $0x18] sm:$0xff] }
 0x1c3   : > { %v864_v0 = vrot.slane %v837_v61, 1  ;;  %v874_v4 = vrot.slane %v837_v61, 2 }
 0x1c4   : > { %1032 = vmatpush.msrb.mxu0 %v951_v48 }
 0x1c5   : > { %868 = vrot.lane.b32.xlu1 %v864_v0, %s1771_s19  ;;  %v875_v5 = vsel %vm872_vm12, %v873_v63, %v874_v4  ;;  %v865_v6 = vsel %vm862_vm13, %v863_v62, %v864_v0  ;;  %v946_v63 = vld [vmem:[#allocation6 + $0x10] sm:$0xff]  ;;  %v945_v0 = vld [vmem:[#allocation6 + $0x8] sm:$0xff] }
 0x1c6   : > { %876 = vrot.lane.b32.xlu2 %v875_v5, %s1772_s21  ;;  %866 = vrot.lane.b32.xlu0 %v865_v6, %s1771_s19  ;;  %v972_v5 = vld [vmem:[#allocation6 + $0xe0] sm:$0xff]  ;;  %v971_v6 = vld [vmem:[#allocation6 + $0xd8] sm:$0xff]  ;;  %s589_s19 = sand.u32 1, %s1755_s24  }
 0x1c7   : > { %1033 = vmatpush.msrb.mxu0 %v950_v19  ;;  %1050 = vmatpush.msrb.mxu3 %v972_v5  ;;  %s590_s20 = scalar_lea.vmem [#allocation8], %s589_s19 }
 0x1c9   : > { %1034 = vmatpush.msrb.mxu0 %v949_v52  ;;  %1051 = vmatpush.msrb.mxu3 %v971_v6 }
 0x1cb   : > { %1035 = vmatpush.msrb.mxu0 %v948_v55  ;;  %1052 = vmatpush.msrb.mxu3 %v970_v9 }
 0x1cd   : > { %1036 = vmatpush.msrb.mxu0 %v947_v60  ;;  %1053 = vmatpush.msrb.mxu3 %v969_v10 }
 0x1ce   : > { %878 = vrot.lane.b32.xlu0 %v874_v4, %s1772_s21  ;;  %v944_v4 = vld [vmem:[#allocation6] sm:$0xff] }
 0x1cf   : > { %1037 = vmatpush.msrb.mxu0 %v946_v63  ;;  %1054 = vmatpush.msrb.mxu3 %v968_v11 }
 0x1d1   : > { %1038 = vmatpush.msrb.mxu0 %v945_v0  ;;  %1055 = vmatpush.msrb.mxu3 %v967_v13 }
 0x1d3   : > { %1039 = vmatpush.msrb.mxu0 %v944_v4  ;;  %1056 = vmatpush.msrb.mxu3 %v966_v15 }
 0x1d5   : > { %1057 = vmatpush.msrb.mxu3 %v965_v18 }
 0x1d7   : > { %1058 = vmatpush.msrb.mxu3 %v964_v21 }
 0x1d9   : > { %1059 = vmatpush.msrb.mxu3 %v963_v1 }
 0x1db   : > { %1060 = vmatpush.msrb.mxu3 %v962_v22 }
 0x1dd   : > { %1061 = vmatpush.msrb.mxu3 %v961_v23 }
 0x220   : > { %v877_v3 = vpop.permute.xlu2 %876 }
 0x221   : > { %1507 = vmatmul.msk.f32.vlgmr.msra.gmra.mxu3 %vm891_vm14, %v877_v3 }
 0x237   : > { %v869_v27 = vpop.permute.xlu1 %868 }
 0x238   : > { %v867_v24 = vpop.permute.xlu0 %866  ;;  %v884_v28 = vsel %vm882_vm15, %v837_v61, %v869_v27 }
 0x239   : > { %v883_v25 = vsel %vm882_vm15, %v836_v57, %v867_v24  ;;  %v960_v24 = vld [vmem:[#allocation6 + $0x80] sm:$0xff] }
 0x23a   : > { %v886_v26 = vsel %vm885_vm1, %v883_v25, %v877_v3  ;;  %v976_v3 = vld [vmem:[#allocation6 + $0x100] sm:$0xff]  ;;  %1062 = vmatpush.msrb.mxu3 %v960_v24 }
 0x23b   : > { %912 = vmatmul.f32.vlgmr.msra.gmra.mxu2 %v886_v26  ;;  %1085 = vmatpush.msrb.mxu1 %v976_v3 }
 0x240   : > { %v879_v29 = vpop.permute.xlu0 %878 }
 0x241   : > { %1508 = vmatmul.msk.f32.gmra.mxu3 %vm891_vm14, %v879_v29  ;;  %v887_v30 = vsel %vm885_vm1, %v884_v28, %v879_v29 }
 0x243   : > { %915 = vmatmul.f32.gmra.mxu2 %v887_v30 }
 0x2a4   : > { %v936_v36 = vpop.f32.mrf.mxu3 }
 0x2be   : > { %v913_v34 = vpop.f32.mrf.mxu2 }
 0x2bf   : > { %v914_v35 = vadd.f32 %v1595_v31, %v913_v34 }
 0x2c1   : > { %v937_v40 = vadd.f32 %v936_v36, %v914_v35 }
 0x2c3   : > { %v942_v43 = vmax.f32 %v937_v40, 0.0 }
 0x2c4   : > { %v939_v45 = vpop.f32.mrf.mxu3 }
 0x2c5   : > { %v984_v47 = vrot.slane %v942_v43, 7 }
 0x2c6   : > { %v916_v44 = vpop.f32.mrf.mxu2 }
 0x2c7   : > { %v917_v20 = vadd.f32 %v1595_v31, %v916_v44  ;;  %v2080_v51 = vsel %vm983_vm2, 0.0, %v984_v47 }
 0x2c8   : > { %v1002_v57 = vrot.slane %v2080_v51, 2  ;;  %v993_v59 = vrot.slane %v2080_v51, 1 }
 0x2c9   : > { %v940_v12 = vadd.f32 %v939_v45, %v917_v20 }
 0x2cb   : > { %v943_v49 = vmax.f32 %v940_v12, 0.0 }
 0x2cd   : > { %v985_v50 = vrot.slane %v943_v49, 7 }
 0x2cf   : > { %v986_v53 = vsel %vm983_vm2, %v984_v47, %v985_v50 }
 0x2d0   : > { %v2084_v54 = vsel %vm862_vm13, %v986_v53, 0.0 }
 0x2d1   : > { %v994_v56 = vrot.slane %v2084_v54, 1  ;;  %v1003_v58 = vrot.slane %v2084_v54, 2 }
 0x2d3   : > { %998 = vrot.lane.b32.xlu0 %v994_v56, %s1773_s29  ;;  %v1004_v61 = vsel %vm872_vm12, %v1002_v57, %v1003_v58  ;;  %v995_v62 = vsel %vm862_vm13, %v993_v59, %v994_v56 }
 0x2d4   : > { %1005 = vrot.lane.b32.xlu1 %v1004_v61, %s1774_s30  ;;  %996 = vrot.lane.b32.xlu2 %v995_v62, %s1773_s29 }
 0x2dc   : > { %1007 = vrot.lane.b32.xlu2 %v1003_v58, %s1774_s30  ;;  %s1367_s30 = scalar_lea.hbm %s2196_s16, %s1887_s15 }
 0x32e   : > { %v997_v25 = vpop.permute.xlu2 %996 }
 0x32f   : > { %v1012_v26 = vsel %vm1011_vm3, %v2080_v51, %v997_v25 }
 0x330   : > { %1040 = vmatmul.f32.vlgmr.msrb.gmra.mxu0 %v1012_v26 }
 0x336   : > { %v1008_v31 = vpop.permute.xlu2 %1007 }
 0x345   : > { %v999_v27 = vpop.permute.xlu0 %998 }
 0x346   : > { %v1006_v28 = vpop.permute.xlu1 %1005  ;;  %v1013_v29 = vsel %vm1011_vm3, %v2084_v54, %v999_v27  ;;  %v1016_v32 = vsel %vm1014_vm4, %v999_v27, %v1008_v31  ;;  %vm1154_vm3 = vcmask 785664  }
 0x347   : > { %1043 = vmatmul.f32.gmra.mxu0 %v1013_v29  ;;  %1509 = vmatmul.msk.f32.vlgmr.msrb.gmra.mxu1 %vm613_vm0, %v1006_v28  ;;  %v1015_v30 = vsel %vm1014_vm4, %v997_v25, %v1006_v28  ;;  %vm1156_vm4 = vcmask 783616  }
 0x348   : > { %1063 = vmatmul.f32.vlgmr.msrb.gmra.mxu3 %v1015_v30 }
 0x34f   : > { %1510 = vmatmul.msk.f32.gmra.mxu1 %vm613_vm0, %v1008_v31 }
 0x350   : > { %1066 = vmatmul.f32.gmra.mxu3 %v1016_v32 }
 0x3ad   : > { %v1041_v34 = vpop.f32.mrf.mxu0 }
 0x3ae   : > { %v1042_v7 = vadd.f32 %v1596_v33, %v1041_v34 }
 0x3c4   : > { %v1087_v35 = vpop.f32.mrf.mxu1  ;;  %v1044_v39 = vpop.f32.mrf.mxu0 }
 0x3c5   : > { %v1045_v41 = vadd.f32 %v1596_v33, %v1044_v39 }
 0x3cb   : > { %v1064_v36 = vpop.f32.mrf.mxu3 }
 0x3cc   : > { %v1065_v37 = vadd.f32 %v1064_v36, %v1042_v7  ;;  %v1090_v43 = vpop.f32.mrf.mxu1  ;;  %v1181_v7 = vld [vmem:[%s2188_s8 + $0x8] sm:$0xff] }
 0x3cd   : > { %1202 = vmatpush.msrb.mxu2 %v1181_v7  ;;  %v1228_v36 = vld [vmem:[%s2190_s10 + $0x8] sm:$0xff] }
 0x3ce   : > { %v1088_v38 = vadd.f32 %v1087_v35, %v1065_v37  ;;  %v1180_v35 = vld [vmem:[%s2188_s8] sm:$0xff]  ;;  %1252 = vmatpush.msra.mxu0 %v1228_v36 }
 0x3cf   : > { %1203 = vmatpush.msrb.mxu2 %v1180_v35  ;;  %v1227_v37 = vld [vmem:[%s2190_s10] sm:$0xff] }
 0x3d0   : > { %v1093_v40 = vsel %vm835_vm11, %v1088_v38, -inf  ;;  %v1139_v8 = vsel %vm1138_vm5, %v1088_v38, -inf  ;;  %v1150_v10 = vmax.f32 %v1088_v38, 0.0  ;;  %1253 = vmatpush.msra.mxu0 %v1227_v37  ;;  %vm1176_vm5 = vcmask 1041408  }
 0x3d1   : > { %1094 = vmax.xlane.f32.xlu1 %v1093_v40 }
 0x3d3   : > { %v1067_v42 = vpop.f32.mrf.mxu3 }
 0x3d4   : > { %v1068_v2 = vadd.f32 %v1067_v42, %v1045_v41 }
 0x3d6   : > { %v1091_v44 = vadd.f32 %v1090_v43, %v1068_v2 }
 0x3d8   : > { %v1141_v20 = vsel %vm1140_vm6, %v1091_v44, -inf  ;;  %v1097_v45 = vsel %vm1096_vm7, %v1091_v44, -inf  ;;  %v1151_v14 = vmax.f32 %v1091_v44, 0.0  ;;  %vm1178_vm6 = vcmask 1042432  }
 0x3d9   : > { %v1142_v46 = vmax.f32 %v1139_v8, %v1141_v20  ;;  %1098 = vmax.xlane.f32.xlu0 %v1097_v45  ;;  %v1262_v8 = vld [vmem:[%s2192_s12 + $0x8] sm:$0xff]  ;;  %v1182_v20 = vld [vmem:[%s2189_s9] sm:$0x1] }
 0x3da   : > { %1284 = vmatpush.msra.mxu1 %v1262_v8 }
 0x3db   : > { %v1143_v27 = vrot.slane %v1142_v46, 4 }
 0x3dd   : > { %v1144_v29 = vmax.f32 %v1142_v46, %v1143_v27 }
 0x3df   : > { %v1145_v30 = vrot.slane %v1144_v29, 2 }
 0x3e1   : > { %v1146_v31 = vmax.f32 %v1144_v29, %v1145_v30 }
 0x3e3   : > { %v1147_v32 = vrot.slane %v1146_v31, 1 }
 0x3e5   : > { %v1148_v33 = vmax.f32 %v1146_v31, %v1147_v32 }
 0x3e7   : > { %v1149_v34 = vmax.f32 %v1148_v33, 0.0 }
 0x444   : > { %v1095_v12 = vpop.xlane.xlu1 %1094 }
 0x445   : > { %v1511_v47 = vmul.f32 -1.442695, %v1095_v12 }
 0x447   : > { %1615 = vpow2.f32 %v1511_v47 }
 0x44c   : > { %v1099_v48 = vpop.xlane.xlu0 %1098 }
 0x44d   : > { %v1616_v49 = vpop.eup %1615  ;;  %v1512_v19 = vmul.f32 -1.442695, %v1099_v48 }
 0x44e   : > { %v1106_v50 = vadd.f32 1.0, %v1616_v49  ;;  %v1261_v49 = vld [vmem:[%s2192_s12] sm:$0xff] }
 0x44f   : > { %1617 = vpow2.f32 %v1512_v19  ;;  %1285 = vmatpush.msra.mxu1 %v1261_v49 }
 0x450   : > { %1619 = vrcp.f32 %v1106_v50  ;;  %v1119_v59 = vand.u32 2147483648, %v1106_v50  ;;  %vm1113_vm9 = vweird.f32 %v1106_v50  ;;  %v1117_v60 = vand.u32 2147483647, %v1106_v50 }
 0x452   : > { %v1120_v0 = vor.u32 1.1754944e-38, %v1119_v59  ;;  %vm1118_vm12 = vcmp.eq.f32.partialorder %v1117_v60, 8.507059e+37 }
 0x455   : > { %v1618_v51 = vpop.eup %1617 }
 0x456   : > { %v1620_v52 = vpop.eup %1619  ;;  %v1107_v53 = vadd.f32 1.0, %v1618_v51 }
 0x457   : > { %v1109_v54 = vmul.f32 %v1620_v52, %v1106_v50  ;;  %vm1114_vm8 = vweird.f32 %v1620_v52 }
 0x458   : > { %1621 = vrcp.f32 %v1107_v53  ;;  %vm1115_vm10 = vmor %vm1113_vm9, %vm1114_vm8  ;;  %v1134_v4 = vand.u32 2147483648, %v1107_v53  ;;  %v1132_v6 = vand.u32 2147483647, %v1107_v53  ;;  %vm1128_vm14 = vweird.f32 %v1107_v53 }
 0x459   : > { %v1110_v55 = vsub.f32 1.0, %v1109_v54 }
 0x45a   : > { %v1135_v13 = vor.u32 1.1754944e-38, %v1134_v4  ;;  %vm1133_vm1 = vcmp.eq.f32.partialorder %v1132_v6, 8.507059e+37  ;;  %v1777_v6 = vmov 0  }
 0x45b   : > { %v1111_v56 = vmul.f32 %v1620_v52, %v1110_v55  ;;  %1594 = vset.pattern.permute.xlu0 %v1777_v6 }
 0x45d   : > { %v1112_v57 = vadd.f32 %v1620_v52, %v1111_v56 }
 0x45e   : > { %v1622_v58 = vpop.eup %1621 }
 0x45f   : > { %v1124_v61 = vmul.f32 %v1622_v58, %v1107_v53  ;;  %v1116_v62 = vsel %vm1115_vm10, %v1620_v52, %v1112_v57  ;;  %vm1129_vm13 = vweird.f32 %v1622_v58  ;;  %vm1305_vm10 = vcmask 482304  }
 0x460   : > { %v1121_v9 = vsel %vm1118_vm12, %v1120_v0, %v1116_v62  ;;  %vm1130_vm15 = vmor %vm1128_vm14, %vm1129_vm13 }
 0x461   : > { %v1125_v63 = vsub.f32 1.0, %v1124_v61  ;;  %v1152_v16 = vmul.f32 %v1150_v10, %v1121_v9  ;;  %v1598_v9 = vld [vmem:[%s2193_s13] ss:$0 sm:$0xff] }
 0x463   : > { %v1126_v5 = vmul.f32 %v1622_v58, %v1125_v63  ;;  %v1155_v21 = vsel %vm1154_vm3, %v1152_v16, -inf  ;;  %v1297_v16 = vld [vmem:[%s2194_s14] sm:$0x1] }
 0x465   : > { %v1127_v11 = vadd.f32 %v1622_v58, %v1126_v5  ;;  %v1298_v5 = vld [vmem:[#allocation2] sm:$0x1] }
 0x466   : > { %1301 = vperm.xlu0 %1594, %v1298_v5  }
 0x467   : > { %v1131_v15 = vsel %vm1130_vm15, %v1622_v58, %v1127_v11  ;;  %v1597_v58 = vld [vmem:[%s2191_s11] ss:$0 sm:$0xff] }
 0x468   : > { %v1136_v17 = vsel %vm1133_vm1, %v1135_v13, %v1131_v15 }
 0x469   : > { %v1153_v18 = vmul.f32 %v1151_v14, %v1136_v17 }
 0x46b   : > { %v1157_v1 = vsel %vm1156_vm4, %v1153_v18, -inf }
 0x46c   : > { %v1158_v22 = vmax.f32 %v1155_v21, %v1157_v1 }
 0x46e   : > { %v1159_v23 = vrot.slane %v1158_v22, 4 }
 0x470   : > { %v1160_v3 = vmax.f32 %v1158_v22, %v1159_v23 }
 0x472   : > { %v1161_v24 = vrot.slane %v1160_v3, 2 }
 0x474   : > { %v1162_v25 = vmax.f32 %v1160_v3, %v1161_v24 }
 0x476   : > { %v1163_v26 = vrot.slane %v1162_v25, 1 }
 0x478   : > { %v1164_v28 = vmax.f32 %v1162_v25, %v1163_v26 }
 0x47a   : > { %1166 = vrot.lane.b32.xlu2 %v1164_v28, %s1772_s21 }
 0x482   : > { %1169 = vrot.lane.b32.xlu2 %v1164_v28, %s1773_s29 }
 0x48a   : > { %1172 = vrot.lane.b32.xlu2 %v1164_v28, %s1775_s28 }
 0x492   : > { %1184 = vrot.lane.b32.xlu2 %v1149_v34, %s1772_s21  ;;  %s1359_s21 = scalar_lea.sflag [#allocation5], %s589_s19 }
 0x4d4   : > { %v1167_v38 = vpop.permute.xlu2 %1166 }
 0x4d5   : > { %v1175_v40 = vsel %vm983_vm2, %v1164_v28, %v1167_v38 }
 0x4d8   : > { %v1302_v17 = vpop.permute.xlu0 %1301 }
 0x4d9   : > { %v1304_v18 = vperm.slane %v1302_v17, 0 }
 0x4dc   : > { %v1170_v39 = vpop.permute.xlu2 %1169 }
 0x4dd   : > { %v1177_v41 = vsel %vm1176_vm5, %v1175_v40, %v1170_v39 }
 0x4e4   : > { %v1173_v42 = vpop.permute.xlu2 %1172 }
 0x4e5   : > { %v1179_v2 = vsel %vm1178_vm6, %v1177_v41, %v1173_v42 }
 0x4e6   : > { %1234 = vrot.lane.b32.xlu2 %v1179_v2, %s1773_s29  ;;  %s1496_s29 = sshll.u32 %s1941_s23, 2  ;;  %s1371_s23 = sshll.u32 %s1367_s30, 4  ;;  %s1372_s23 = int_to_ptr.hbm [resolvable:$true] %s1371_s23 }
 0x4e7   : > { %s608_s27 = scalar_lea.vmem %s2183_s3, %s1496_s29  ;;  %s1707_s28 = sshra.s32 %s1372_s23, 4  ;;  %s1708_s28 = int_to_ptr.hbm [resolvable:$true] %s1707_s28 }
 0x4e8   : > { %v1291_v19 = vld [vmem:[%s608_s27] sm:$0xf]  ;;  %s1709_s15 = scalar_lea.hbm %s1708_s28, 1  ;;  %s1713_s29 = scalar_lea.hbm %s2196_s16, 2 }
 0x4e9   : > { %1293 = vrot.lane.b32.xlu1 %v1291_v19, %s1776_s25  ;;  %s1369_s25 = sshll.u32 %s590_s20, 4  ;;  %p1710_p0 = scmp.ne.s32.totalorder %s1708_s28, %s1709_s15  ;;  %s1370_s25 = int_to_ptr.vmem [resolvable:$true] %s1369_s25 }
 0x4ea   : > { %p1714_p3 = scmp.lt.s32.totalorder %s1708_s28, %s2196_s16  ;;  %p1715_p4 = scmp.lt.s32.totalorder %s1713_s29, %s1709_s15 }
 0x4eb   : > { %p1711_p1 = pnand %p1710_p0, %p1904_p5 }
 0x4ec   : > { %v1185_v43 = vpop.permute.xlu2 %1184  ;;  %p1716_p7 = por %p1715_p4, %p1714_p3 }
 0x4ed   : > { %1513 = vmatmul.msk.f32.vlgmr.msrb.gmra.mxu2 %vm835_vm11, %v1185_v43  ;;  %p1712_p2 = pneg %p1711_p1 }
 0x4ef   : > { %p1717_p8 = pnand %p1716_p7, %p1712_p2 }
 0x540   : > { %v1235_v44 = vpop.permute.xlu2 %1234 }
 0x541   : > { %1515 = vmatmul.msk.f32.vlgmr.msra.gmra.mxu0 %vm835_vm11, %v1235_v44 }
 0x55b   : > { %v1294_v13 = vpop.permute.xlu1 %1293 }
 0x570   : > { %v1205_v45 = vpop.f32.mrf.mxu2 }
 0x571   : > { %v1206_v46 = vadd.f32 %v1205_v45, %v1182_v20 }
 0x573   : > { %v1514_v12 = vmul.f32 -1.442695, %v1206_v46 }
 0x575   : > { %1623 = vpow2.f32 %v1514_v12 }
 0x57b   : > { %v1624_v47 = vpop.eup %1623 }
 0x57c   : > { %v1211_v48 = vadd.f32 1.0, %v1624_v47 }
 0x57e   : > { %1625 = vrcp.f32 %v1211_v48  ;;  %v1223_v55 = vand.u32 2147483648, %v1211_v48  ;;  %vm1217_vm7 = vweird.f32 %v1211_v48  ;;  %v1221_v56 = vand.u32 2147483647, %v1211_v48 }
 0x580   : > { %v1224_v59 = vor.u32 1.1754944e-38, %v1223_v55  ;;  %vm1222_vm9 = vcmp.eq.f32.partialorder %v1221_v56, 8.507059e+37 }
 0x584   : > { %v1626_v50 = vpop.eup %1625 }
 0x585   : > { %v1213_v51 = vmul.f32 %v1626_v50, %v1211_v48  ;;  %vm1218_vm2 = vweird.f32 %v1626_v50 }
 0x586   : > { %vm1219_vm8 = vmor %vm1217_vm7, %vm1218_vm2 }
 0x587   : > { %v1214_v52 = vsub.f32 1.0, %v1213_v51 }
 0x589   : > { %v1215_v53 = vmul.f32 %v1626_v50, %v1214_v52 }
 0x58b   : > { %v1216_v54 = vadd.f32 %v1626_v50, %v1215_v53 }
 0x58d   : > { %v1220_v57 = vsel %vm1219_vm8, %v1626_v50, %v1216_v54 }
 0x58e   : > { %v1225_v60 = vsel %vm1222_vm9, %v1224_v59, %v1220_v57 }
 0x58f   : > { %v1259_v0 = vperm.slane %v1225_v60, 0 }
 0x5be   : > { %v1255_v61 = vpop.f32.mrf.mxu0 }
 0x5bf   : > { %v1256_v62 = vadd.f32 %v1597_v58, %v1255_v61 }
 0x5c1   : > { %v1258_v63 = vmax.f32 %v1256_v62, 0.0 }
 0x5c3   : > { %v1260_v4 = vmul.f32 %v1259_v0, %v1258_v63 }
 0x5c5   : > { %1516 = vmatmul.msk.f32.vlgmr.msra.gmra.mxu1 %vm835_vm11, %v1260_v4  ;;  %vm1332_vm11 = vcmask 24576  }
 0x642   : > { %v1287_v10 = vpop.f32.mrf.mxu1 }
 0x643   : > { %v1288_v11 = vadd.f32 %v1598_v9, %v1287_v10 }
 0x645   : > { %1627 = vtanh.f32 %v1288_v11 }
 0x64b   : > { %v1628_v14 = vpop.eup %1627 }
 0x64c   : > { %v1296_v15 = vsel %vm613_vm0, %v1628_v14, %v1294_v13 }
 0x64d   : > { %1517 = vmatpush.xpose.msk.msra.mxu2 %vm1305_vm10, %v1296_v15 }
 0x650   : > { %1518 = vmatmul.msk.f32.vlgmr.msra.gmra.mxu2 %vm1305_vm10, %v1297_v16 }
 0x6d3   : > { %v1329_v21 = vpop.f32.mrf.mxu2 }
 0x6d4   : > { %v1330_v1 = vadd.f32 %v1329_v21, %v1304_v18 }
 0x6d6   : > { %v1333_v22 = vsel %vm1332_vm11, %v1330_v1, -inf }
 0x6d7   : > { %1334 = vmax.xlane.f32.xlu2 %v1333_v22 }
 0x74a   : > { %v1335_v23 = vpop.xlane.xlu2 %1334 }
 0x74b   : > { %v1336_v3 = vsub.f32 %v1330_v1, %v1335_v23 }
 0x74d   : > { %v1337_v24 = vmul.f32 1.442695, %v1336_v3 }
 0x74f   : > { %1629 = vpow2.f32 %v1337_v24 }
 0x755   : > { %v1630_v25 = vpop.eup %1629 }
 0x756   : > { %v1339_v26 = vsel %vm1332_vm11, %v1630_v25, 0.0 }
 0x757   : > { %1340 = vadd.xlane.f32.xlu1 %v1339_v26 }
 0x7ca   : > { %v1341_v27 = vpop.xlane.xlu1 %1340 }
 0x7cb   : > { %1631 = vrcp.f32 %v1341_v27  ;;  %v1353_v31 = vand.u32 2147483648, %v1341_v27  ;;  %v1351_v33 = vand.u32 2147483647, %v1341_v27  ;;  %vm1347_vm12 = vweird.f32 %v1341_v27 }
 0x7cd   : > { %v1354_v7 = vor.u32 1.1754944e-38, %v1353_v31  ;;  %vm1352_vm14 = vcmp.eq.f32.partialorder %v1351_v33, 8.507059e+37 }
 0x7d1   : > { %v1632_v28 = vpop.eup %1631 }
 0x7d2   : > { %v1343_v29 = vmul.f32 %v1632_v28, %v1341_v27  ;;  %vm1348_vm0 = vweird.f32 %v1632_v28 }
 0x7d3   : > { %vm1349_vm13 = vmor %vm1347_vm12, %vm1348_vm0 }
 0x7d4   : > { %v1344_v30 = vsub.f32 1.0, %v1343_v29 }
 0x7d6   : > { %v1345_v32 = vmul.f32 %v1632_v28, %v1344_v30 }
 0x7d8   : > { %v1346_v34 = vadd.f32 %v1632_v28, %v1345_v32 }
 0x7da   : > { %v1350_v35 = vsel %vm1349_vm13, %v1632_v28, %v1346_v34 }
 0x7db   : > { %v1355_v36 = vsel %vm1352_vm14, %v1354_v7, %v1350_v35 }
 0x7dc   : > { %v1356_v37 = vmul.f32 %v1630_v25, %v1355_v36 }
 0x7de   : > { %1357 = vst.msk [vmem:[%s590_s20] sm:$0x1] %vm1332_vm11, %v1356_v37 }
 0x7df   : > { %1720 = shalt.err (!%p1717_p8)
}
 0x7e0   : > { %1531 = dma.vmem_to_hbm [thread:$0]  (%p1904_p5), %s1370_s25, 16, %s1372_s23, %s1359_s21  }
 0x7e1 PF: > { %s2214_s19 = sld [smem:[#allocation12_spill]]  ;;  %p1548_p9 = scmp.ge.s32.totalorder %s1763_s26, 2 }
 0x7e3   : > { %p1541_p10 = pnand %p1548_p9, %p1908_p6 }
 0x7e5   : > { %p1542_p11 = pneg %p1541_p10 }
 0x7e7   : > { %s1383_s20 = sand.u32 1, %s2214_s19  }
 0x7e8   : > { %s1384_s0 = scalar_lea.sflag [#allocation5], %s1383_s20 }
 0x7e9   : > { %1746 = dma.done.wait (%p1542_p11), %s1384_s0, 16  }
 0x7ea   : > { %1748 = vsyncadd (%p1542_p11), %s1384_s0, 4294967280  ;;  %s2216_s26 = sld [smem:[#allocation14_spill]]  ;;  %s2219_s23 = smov %s1755_s24 }
 0x7eb   : > { %s2217_s28 = sld [smem:[#allocation13_spill]] }
 0x7ec   : > { %s2218_s25 = sld [smem:[#allocation15_spill]] }
 0x7f0   : > { %p30_p12 = scmp.ge.s32.totalorder %s2216_s26, 4  }
 0x7f1   : > { %s2220_s24 = smov %s2217_s28 }
 0x7f2   :  { %32 = sbr.rel (!%p30_p12) target bundleno = 8 (0x8), region = 137 }
 0x7f7   :  { %1389 = vsyncpa [#allocation4], 1 }
 0x7f8   :  { %1391 = vsyncpa [#allocation4 + $0x1], 1 }
 0x7f9   :  { %1392 = vsyncpa [#allocation7], 1 }
 0x7fa   :  { %1393 = vsyncpa [#allocation5], 1 }
 0x7fb   :  { %1395 = vsyncpa [#allocation5 + $0x1], 1 }

</bundles_post_ra>
